<compile_context>
chip_gen: v6e
topology: v6e:2x2x1
jax: 0.10.0
libtpu: 0.0.40
codegen_flags: <defaults>
</compile_context>

<pallas_src>
import jax
import jax.numpy as jnp
from jax import lax
from jax.experimental import pallas as pl
from jax.experimental.pallas import tpu as pltpu


# ------------------------------ fused kernel ---------------------------------

def make_predictor_kernel(B, H, W):
    Wp = W + 2                    # padded width (1 zero on each side of W)
    HWp = H * Wp
    R = B * HWp                   # real flattened spatial size
    Rp = ((R + 127) // 128) * 128 # lane-padded
    C_IN = (1, 2, 4, 8)
    C_OUT = (2, 4, 8, 12)
    counts = (float(B * H * W), float(B * H * W),
              float(B * H * (W - 2)), float(B * H * (W - 4)))
    # row offsets of each conv's stacked taps [W_k0; W_k1; W_k2] inside wpack
    w_off, off = [], 0
    for co in C_OUT:
        w_off.append(off)
        off += 3 * co
    n_wrows = off                 # 78

    def kernel(x_ref, wpack_ref, bnpack_ref, wfc_ref, fcb_ref, o_ref):
        f32 = jnp.float32

        # ---- validity masks over the padded-width coordinate (built once) ----
        r1 = lax.broadcasted_iota(jnp.int32, (1, Rp), 1)
        p = r1 % Wp
        validr = r1 < R
        m12 = ((p >= 1) & (p <= W) & validr).astype(f32)
        m3 = ((p >= 2) & (p <= W - 1) & validr).astype(f32)
        m4 = ((p >= 3) & (p <= W - 2) & validr).astype(f32)
        masks = (m12, m12, m3, m4)

        # ---- lane-shift operators: (a @ Sp)[:,r]=a[:,r-1], (a @ Sm)[:,r]=a[:,r+1]
        rows = lax.broadcasted_iota(jnp.int32, (Rp, Rp), 0)
        cols = lax.broadcasted_iota(jnp.int32, (Rp, Rp), 1)
        Sp = (cols == rows + 1).astype(f32)
        Sm = (cols + 1 == rows).astype(f32)

        wpack = wpack_ref[...]        # (78, 8) stacked conv taps
        bnpack = bnpack_ref[...]      # (12, 8) BN gamma/beta columns

        a = x_ref[...]                # (1, Rp) lane-major padded input
        for i in range(4):
            ci, co = C_IN[i], C_OUT[i]
            wall = wpack[w_off[i]:w_off[i] + 3 * co, 0:ci]            # (3co, ci)
            if ci == 1:
                z = wall * a                                          # outer product
            else:
                z = jnp.dot(wall, a, preferred_element_type=f32)      # (3co, Rp)
            # combine the 3 taps: tap0 uses a[r-1], tap1 a[r], tap2 a[r+1]
            y = (jnp.dot(z[0:co, :], Sp, preferred_element_type=f32)
                 + z[co:2 * co, :]
                 + jnp.dot(z[2 * co:3 * co, :], Sm, preferred_element_type=f32))
            # training-mode BatchNorm (one-pass stats over valid positions) + ReLU
            gamma = bnpack[0:co, 2 * i:2 * i + 1]                     # (co, 1)
            beta = bnpack[0:co, 2 * i + 1:2 * i + 2]                  # (co, 1)
            m = masks[i]
            inv = 1.0 / counts[i]
            ym = y * m
            mean = jnp.sum(ym, axis=1, keepdims=True) * inv
            var = jnp.sum(ym * ym, axis=1, keepdims=True) * inv - mean * mean
            scale = gamma * lax.rsqrt(var + 1e-5)
            a = jnp.maximum((y - mean) * scale + beta, 0.0) * m       # (co, Rp)

        # ---- fused FC (PyTorch flatten order folded into wfc) + softmax ----
        rb = lax.broadcasted_iota(jnp.int32, (B, Rp), 1)
        bb = lax.broadcasted_iota(jnp.int32, (B, Rp), 0)
        lower = bb * HWp
        bm = ((rb >= lower) & (rb < lower + HWp)).astype(f32)         # (B, Rp)

        lane_o = lax.broadcasted_iota(jnp.int32, (1, 12), 1)
        logits = jnp.zeros((B, 12), f32)
        for o in range(12):
            wslab = wfc_ref[:, o * Rp:(o + 1) * Rp]                   # (12, Rp)
            s = jnp.sum(wslab * a, axis=0, keepdims=True)             # (1, Rp)
            col = jnp.sum(bm * s, axis=1, keepdims=True) + fcb_ref[o] # (B, 1)
            logits = logits + col * (lane_o == o).astype(f32)

        mx = jnp.max(logits, axis=1, keepdims=True)
        e = jnp.exp(logits - mx)
        denom = jnp.sum(e, axis=1, keepdims=True)
        o_ref[...] = e * pl.reciprocal(denom, approx=False)

    return kernel, Rp, w_off, n_wrows


# --------------------------------- wrapper -----------------------------------

def predictor_forward(x, params):
    # x: (B, 1, H, W) float32 NCHW, same convention as the PyTorch module.
    B, Cin, H, W = x.shape
    assert Cin == 1 and 12 * H * (W - 4) == 288, "shapes must feed Linear(288, 12)"
    Wp = W + 2
    HWp = H * Wp
    R = B * HWp
    f32 = jnp.float32

    kernel, Rp, w_off, n_wrows = make_predictor_kernel(B, H, W)

    # input as a single lane-major row, zero padding lives in the layout
    x_pad = jnp.pad(x[:, 0, :, :].astype(f32), ((0, 0), (0, 0), (1, 1)))  # (B,H,Wp)
    x_row = jnp.pad(x_pad.reshape(1, R), ((0, 0), (0, Rp - R)))           # (1, Rp)

    # pack conv tap weights [W_k0; W_k1; W_k2] per conv (biases dropped: BN cancels them)
    wpack = jnp.zeros((n_wrows, 8), f32)
    for i in range(4):
        w = params[f"conv{i+1}_w"].astype(f32)                 # (co, ci, 1, 3)
        co, ci = w.shape[0], w.shape[1]
        wall = jnp.concatenate([w[:, :, 0, 0], w[:, :, 0, 1], w[:, :, 0, 2]], axis=0)
        wpack = wpack.at[w_off[i]:w_off[i] + 3 * co, 0:ci].set(wall)

    # pack BN affine params as column vectors (gamma_i, beta_i) per conv
    bnpack = jnp.zeros((12, 8), f32)
    for i in range(4):
        g = params[f"bn{i+1}_g"].astype(f32)
        b = params[f"bn{i+1}_b"].astype(f32)
        co = g.shape[0]
        bnpack = bnpack.at[0:co, 2 * i].set(g)
        bnpack = bnpack.at[0:co, 2 * i + 1].set(b)

    # fold the PyTorch NCHW flatten order into the FC weight: wfc[c, o*Rp + r]
    C4, Wv = 12, W - 4
    fc_w = params["fc_w"].astype(f32)                          # (12, 288)
    r = jnp.arange(Rp)
    p = r % Wp
    h = (r % HWp) // Wp
    valid = ((p >= 3) & (p <= W - 2) & (r < R)).astype(f32)
    wprime = jnp.clip(p - 3, 0, Wv - 1)
    cidx = jnp.arange(C4)
    col = cidx[:, None] * (H * Wv) + h[None, :] * Wv + wprime[None, :]   # (C4, Rp)
    wsel = fc_w[:, col] * valid[None, None, :]                           # (12, C4, Rp)
    wfc = jnp.transpose(wsel, (1, 0, 2)).reshape(C4, 12 * Rp)            # (C4, 12*Rp)
    fcb = params["fc_b"].astype(f32)                                     # (12,)

    vmem = pl.BlockSpec(memory_space=pltpu.MemorySpace.VMEM)
    smem = pl.BlockSpec(memory_space=pltpu.MemorySpace.SMEM)

    out = pl.pallas_call(
        kernel,
        out_shape=jax.ShapeDtypeStruct((B, 12), f32),
        in_specs=[vmem, vmem, vmem, vmem, smem],
        out_specs=vmem,
        compiler_params=pltpu.CompilerParams(vmem_limit_bytes=32 * 1024 * 1024),
    )(x_row, wpack, bnpack, wfc, fcb)
    return out


# --------------------------- params / JAX reference ---------------------------

def init_params(key):
    ks = jax.random.split(key, 18)
    p = {}
    chans = [(1, 2), (2, 4), (4, 8), (8, 12)]
    k = 0
    for i, (ci, co) in enumerate(chans, start=1):
        p[f"conv{i}_w"] = 0.3 * jax.random.normal(ks[k], (co, ci, 1, 3), jnp.float32); k += 1
        p[f"conv{i}_b"] = 0.1 * jax.random.normal(ks[k], (co,), jnp.float32); k += 1
        p[f"bn{i}_g"] = 1.0 + 0.1 * jax.random.normal(ks[k], (co,), jnp.float32); k += 1
        p[f"bn{i}_b"] = 0.1 * jax.random.normal(ks[k], (co,), jnp.float32); k += 1
    p["fc_w"] = 0.1 * jax.random.normal(ks[k], (12, 288), jnp.float32); k += 1
    p["fc_b"] = 0.1 * jax.random.normal(ks[k], (12,), jnp.float32); k += 1
    return p


def ref_forward(x, p):
    # Pure-JAX reference (training-mode BatchNorm, like a fresh nn.Module).
    def conv(h, w, b, pad):
        y = lax.conv_general_dilated(h, w, (1, 1), ((0, 0), (pad, pad)),
                                     dimension_numbers=("NCHW", "OIHW", "NCHW"))
        return y + b.reshape(1, -1, 1, 1)

    def bn_relu(h, g, be):
        mean = jnp.mean(h, axis=(0, 2, 3), keepdims=True)
        var = jnp.mean((h - mean) ** 2, axis=(0, 2, 3), keepdims=True)
        hn = (h - mean) / jnp.sqrt(var + 1e-5)
        return jax.nn.relu(g.reshape(1, -1, 1, 1) * hn + be.reshape(1, -1, 1, 1))

    h = bn_relu(conv(x, p["conv1_w"], p["conv1_b"], 1), p["bn1_g"], p["bn1_b"])
    h = bn_relu(conv(h, p["conv2_w"], p["conv2_b"], 1), p["bn2_g"], p["bn2_b"])
    h = bn_relu(conv(h, p["conv3_w"], p["conv3_b"], 0), p["bn3_g"], p["bn3_b"])
    h = bn_relu(conv(h, p["conv4_w"], p["conv4_b"], 0), p["bn4_g"], p["bn4_b"])
    flat = h.reshape(h.shape[0], -1)
    return jax.nn.softmax(flat @ p["fc_w"].T + p["fc_b"], axis=-1)


if __name__ == "__main__":
    key = jax.random.PRNGKey(0)
    pkey, xkey = jax.random.split(key)
    params = init_params(pkey)

    # B=2, Cin=1, H=4, W=10  ->  conv4 output (2, 12, 4, 6) -> flatten = 288
    x = jax.random.normal(xkey, (2, 1, 4, 10), jnp.float32)

    out = predictor_forward(x, params)
    out = jax.block_until_ready(out)

    ref = ref_forward(x, params)
    assert out.shape == (2, 12)
    assert bool(jnp.allclose(jnp.sum(out, axis=-1), 1.0, atol=1e-5))
    assert bool(jnp.allclose(out, ref, atol=2e-4, rtol=2e-4))
    print("KERNEL_OK")
</pallas_src>

<mosaic_0001>
module attributes {stable_mosaic.version = 11 : i64} {
  func.func @kernel(%arg0: memref<1x128xf32, #tpu.memory_space<vmem>>, %arg1: memref<78x8xf32, #tpu.memory_space<vmem>>, %arg2: memref<12x8xf32, #tpu.memory_space<vmem>>, %arg3: memref<12x1536xf32, #tpu.memory_space<vmem>>, %arg4: memref<12xf32, #tpu.memory_space<smem>>, %arg5: memref<2x12xf32, #tpu.memory_space<vmem>>) attributes {dimension_semantics = [], scalar_prefetch = 0 : i64, scratch_operands = 0 : i64, tpu.core_type = #tpu.core_type<tc>} {
    %0 = tpu.iota {dimensions = array<i32: 1>} : vector<1x128xi32>
    %c12_i32 = arith.constant 12 : i32
    %c0_i32 = arith.constant 0 : i32
    %1 = arith.cmpi eq, %c12_i32, %c0_i32 : i32
    %c1_i32 = arith.constant 1 : i32
    %2 = arith.select %1, %c1_i32, %c12_i32 : i32
    %3 = vector.broadcast %2 : i32 to vector<1x128xi32>
    %4 = arith.remsi %0, %3 : vector<1x128xi32>
    %c0_i32_0 = arith.constant 0 : i32
    %5 = vector.broadcast %c0_i32_0 : i32 to vector<1x128xi32>
    %6 = arith.cmpi ne, %4, %5 : vector<1x128xi32>
    %c0_i32_1 = arith.constant 0 : i32
    %7 = vector.broadcast %c0_i32_1 : i32 to vector<1x128xi32>
    %8 = arith.cmpi slt, %4, %7 : vector<1x128xi32>
    %c0_i32_2 = arith.constant 0 : i32
    %9 = arith.cmpi slt, %2, %c0_i32_2 : i32
    %10 = vector.broadcast %9 : i1 to vector<1x128xi1>
    %11 = vector.broadcast %10 : vector<1x128xi1> to vector<1x128xi1>
    %12 = arith.xori %8, %11 : vector<1x128xi1>
    %13 = arith.andi %12, %6 : vector<1x128xi1>
    %14 = vector.broadcast %2 : i32 to vector<1x128xi32>
    %15 = arith.addi %4, %14 : vector<1x128xi32>
    %16 = arith.select %13, %15, %4 : vector<1x128xi1>, vector<1x128xi32>
    %c96_i32 = arith.constant 96 : i32
    %17 = vector.broadcast %c96_i32 : i32 to vector<1x128xi32>
    %18 = arith.cmpi slt, %0, %17 : vector<1x128xi32>
    %c1_i32_3 = arith.constant 1 : i32
    %19 = vector.broadcast %c1_i32_3 : i32 to vector<1x128xi32>
    %20 = arith.cmpi sge, %16, %19 : vector<1x128xi32>
    %c10_i32 = arith.constant 10 : i32
    %21 = vector.broadcast %c10_i32 : i32 to vector<1x128xi32>
    %22 = arith.cmpi sle, %16, %21 : vector<1x128xi32>
    %23 = arith.andi %20, %22 : vector<1x128xi1>
    %24 = arith.andi %23, %18 : vector<1x128xi1>
    %25 = arith.extui %24 : vector<1x128xi1> to vector<1x128xi32>
    %26 = arith.sitofp %25 : vector<1x128xi32> to vector<1x128xf32>
    %c2_i32 = arith.constant 2 : i32
    %27 = vector.broadcast %c2_i32 : i32 to vector<1x128xi32>
    %28 = arith.cmpi sge, %16, %27 : vector<1x128xi32>
    %c9_i32 = arith.constant 9 : i32
    %29 = vector.broadcast %c9_i32 : i32 to vector<1x128xi32>
    %30 = arith.cmpi sle, %16, %29 : vector<1x128xi32>
    %31 = arith.andi %28, %30 : vector<1x128xi1>
    %32 = arith.andi %31, %18 : vector<1x128xi1>
    %33 = arith.extui %32 : vector<1x128xi1> to vector<1x128xi32>
    %34 = arith.sitofp %33 : vector<1x128xi32> to vector<1x128xf32>
    %c3_i32 = arith.constant 3 : i32
    %35 = vector.broadcast %c3_i32 : i32 to vector<1x128xi32>
    %36 = arith.cmpi sge, %16, %35 : vector<1x128xi32>
    %c8_i32 = arith.constant 8 : i32
    %37 = vector.broadcast %c8_i32 : i32 to vector<1x128xi32>
    %38 = arith.cmpi sle, %16, %37 : vector<1x128xi32>
    %39 = arith.andi %36, %38 : vector<1x128xi1>
    %40 = arith.andi %39, %18 : vector<1x128xi1>
    %41 = arith.extui %40 : vector<1x128xi1> to vector<1x128xi32>
    %42 = arith.sitofp %41 : vector<1x128xi32> to vector<1x128xf32>
    %43 = tpu.iota {dimensions = array<i32: 0>} : vector<128x128xi32>
    %44 = tpu.iota {dimensions = array<i32: 1>} : vector<128x128xi32>
    %c1_i32_4 = arith.constant 1 : i32
    %45 = vector.broadcast %c1_i32_4 : i32 to vector<128x128xi32>
    %46 = arith.addi %43, %45 : vector<128x128xi32>
    %47 = arith.cmpi eq, %44, %46 : vector<128x128xi32>
    %48 = arith.extui %47 : vector<128x128xi1> to vector<128x128xi32>
    %49 = arith.sitofp %48 : vector<128x128xi32> to vector<128x128xf32>
    %c1_i32_5 = arith.constant 1 : i32
    %50 = vector.broadcast %c1_i32_5 : i32 to vector<128x128xi32>
    %51 = arith.addi %44, %50 : vector<128x128xi32>
    %52 = arith.cmpi eq, %51, %43 : vector<128x128xi32>
    %53 = arith.extui %52 : vector<128x128xi1> to vector<128x128xi32>
    %54 = arith.sitofp %53 : vector<128x128xi32> to vector<128x128xf32>
    %c0 = arith.constant 0 : index
    %c0_6 = arith.constant 0 : index
    %55 = vector.load %arg1[%c0, %c0_6] : memref<78x8xf32, #tpu.memory_space<vmem>>, vector<78x8xf32>
    %c0_7 = arith.constant 0 : index
    %c0_8 = arith.constant 0 : index
    %56 = vector.load %arg2[%c0_7, %c0_8] : memref<12x8xf32, #tpu.memory_space<vmem>>, vector<12x8xf32>
    %c0_9 = arith.constant 0 : index
    %c0_10 = arith.constant 0 : index
    %57 = vector.load %arg0[%c0_9, %c0_10] : memref<1x128xf32, #tpu.memory_space<vmem>>, vector<1x128xf32>
    %58 = vector.extract_strided_slice %55 {offsets = [0, 0], sizes = [6, 1], strides = [1, 1]} : vector<78x8xf32> to vector<6x1xf32>
    %59 = vector.broadcast %58 : vector<6x1xf32> to vector<6x128xf32>
    %60 = vector.broadcast %57 : vector<1x128xf32> to vector<6x128xf32>
    %61 = arith.mulf %59, %60 : vector<6x128xf32>
    %62 = vector.extract_strided_slice %61 {offsets = [0, 0], sizes = [2, 128], strides = [1, 1]} : vector<6x128xf32> to vector<2x128xf32>
    %cst = arith.constant dense<0.000000e+00> : vector<2x128xf32>
    %63 = tpu.matmul %62, %49, %cst {dimension_numbers = #tpu.dot_dimension_numbers<[1], [0], [0], [1], [0, 0, 1, 1], [], []>} : vector<2x128xf32>, vector<128x128xf32>, vector<2x128xf32> -> vector<2x128xf32>
    %64 = vector.extract_strided_slice %61 {offsets = [2, 0], sizes = [2, 128], strides = [1, 1]} : vector<6x128xf32> to vector<2x128xf32>
    %65 = arith.addf %63, %64 : vector<2x128xf32>
    %66 = vector.extract_strided_slice %61 {offsets = [4, 0], sizes = [2, 128], strides = [1, 1]} : vector<6x128xf32> to vector<2x128xf32>
    %cst_11 = arith.constant dense<0.000000e+00> : vector<2x128xf32>
    %67 = tpu.matmul %66, %54, %cst_11 {dimension_numbers = #tpu.dot_dimension_numbers<[1], [0], [0], [1], [0, 0, 1, 1], [], []>} : vector<2x128xf32>, vector<128x128xf32>, vector<2x128xf32> -> vector<2x128xf32>
    %68 = arith.addf %65, %67 : vector<2x128xf32>
    %69 = vector.extract_strided_slice %56 {offsets = [0, 0], sizes = [2, 1], strides = [1, 1]} : vector<12x8xf32> to vector<2x1xf32>
    %70 = vector.extract_strided_slice %56 {offsets = [0, 1], sizes = [2, 1], strides = [1, 1]} : vector<12x8xf32> to vector<2x1xf32>
    %71 = vector.broadcast %26 : vector<1x128xf32> to vector<2x128xf32>
    %72 = arith.mulf %68, %71 : vector<2x128xf32>
    %cst_12 = arith.constant dense<0.000000e+00> : vector<2xf32>
    %73 = vector.multi_reduction <add>, %72, %cst_12 [1] : vector<2x128xf32> to vector<2xf32>
    %74 = vector.shape_cast %73 : vector<2xf32> to vector<2x1xf32>
    %cst_13 = arith.constant 1.250000e-02 : f32
    %75 = vector.broadcast %cst_13 : f32 to vector<2x1xf32>
    %76 = arith.mulf %74, %75 : vector<2x1xf32>
    %77 = arith.mulf %72, %72 : vector<2x128xf32>
    %cst_14 = arith.constant dense<0.000000e+00> : vector<2xf32>
    %78 = vector.multi_reduction <add>, %77, %cst_14 [1] : vector<2x128xf32> to vector<2xf32>
    %79 = vector.shape_cast %78 : vector<2xf32> to vector<2x1xf32>
    %cst_15 = arith.constant 1.250000e-02 : f32
    %80 = vector.broadcast %cst_15 : f32 to vector<2x1xf32>
    %81 = arith.mulf %79, %80 : vector<2x1xf32>
    %82 = arith.mulf %76, %76 : vector<2x1xf32>
    %83 = arith.subf %81, %82 : vector<2x1xf32>
    %cst_16 = arith.constant 9.99999974E-6 : f32
    %84 = vector.broadcast %cst_16 : f32 to vector<2x1xf32>
    %85 = arith.addf %83, %84 : vector<2x1xf32>
    %86 = math.rsqrt %85 : vector<2x1xf32>
    %87 = arith.mulf %69, %86 : vector<2x1xf32>
    %88 = vector.broadcast %76 : vector<2x1xf32> to vector<2x128xf32>
    %89 = arith.subf %68, %88 : vector<2x128xf32>
    %90 = vector.broadcast %87 : vector<2x1xf32> to vector<2x128xf32>
    %91 = arith.mulf %89, %90 : vector<2x128xf32>
    %92 = vector.broadcast %70 : vector<2x1xf32> to vector<2x128xf32>
    %93 = arith.addf %91, %92 : vector<2x128xf32>
    %cst_17 = arith.constant 0.000000e+00 : f32
    %94 = vector.broadcast %cst_17 : f32 to vector<2x128xf32>
    %95 = arith.maximumf %93, %94 : vector<2x128xf32>
    %96 = vector.broadcast %26 : vector<1x128xf32> to vector<2x128xf32>
    %97 = arith.mulf %95, %96 : vector<2x128xf32>
    %98 = vector.extract_strided_slice %55 {offsets = [6, 0], sizes = [12, 2], strides = [1, 1]} : vector<78x8xf32> to vector<12x2xf32>
    %cst_18 = arith.constant dense<0.000000e+00> : vector<12x128xf32>
    %99 = tpu.matmul %98, %97, %cst_18 {dimension_numbers = #tpu.dot_dimension_numbers<[1], [0], [0], [1], [0, 0, 1, 1], [], []>} : vector<12x2xf32>, vector<2x128xf32>, vector<12x128xf32> -> vector<12x128xf32>
    %100 = vector.extract_strided_slice %99 {offsets = [0, 0], sizes = [4, 128], strides = [1, 1]} : vector<12x128xf32> to vector<4x128xf32>
    %cst_19 = arith.constant dense<0.000000e+00> : vector<4x128xf32>
    %101 = tpu.matmul %100, %49, %cst_19 {dimension_numbers = #tpu.dot_dimension_numbers<[1], [0], [0], [1], [0, 0, 1, 1], [], []>} : vector<4x128xf32>, vector<128x128xf32>, vector<4x128xf32> -> vector<4x128xf32>
    %102 = vector.extract_strided_slice %99 {offsets = [4, 0], sizes = [4, 128], strides = [1, 1]} : vector<12x128xf32> to vector<4x128xf32>
    %103 = arith.addf %101, %102 : vector<4x128xf32>
    %104 = vector.extract_strided_slice %99 {offsets = [8, 0], sizes = [4, 128], strides = [1, 1]} : vector<12x128xf32> to vector<4x128xf32>
    %cst_20 = arith.constant dense<0.000000e+00> : vector<4x128xf32>
    %105 = tpu.matmul %104, %54, %cst_20 {dimension_numbers = #tpu.dot_dimension_numbers<[1], [0], [0], [1], [0, 0, 1, 1], [], []>} : vector<4x128xf32>, vector<128x128xf32>, vector<4x128xf32> -> vector<4x128xf32>
    %106 = arith.addf %103, %105 : vector<4x128xf32>
    %107 = vector.extract_strided_slice %56 {offsets = [0, 2], sizes = [4, 1], strides = [1, 1]} : vector<12x8xf32> to vector<4x1xf32>
    %108 = vector.extract_strided_slice %56 {offsets = [0, 3], sizes = [4, 1], strides = [1, 1]} : vector<12x8xf32> to vector<4x1xf32>
    %109 = vector.broadcast %26 : vector<1x128xf32> to vector<4x128xf32>
    %110 = arith.mulf %106, %109 : vector<4x128xf32>
    %cst_21 = arith.constant dense<0.000000e+00> : vector<4xf32>
    %111 = vector.multi_reduction <add>, %110, %cst_21 [1] : vector<4x128xf32> to vector<4xf32>
    %112 = vector.shape_cast %111 : vector<4xf32> to vector<4x1xf32>
    %cst_22 = arith.constant 1.250000e-02 : f32
    %113 = vector.broadcast %cst_22 : f32 to vector<4x1xf32>
    %114 = arith.mulf %112, %113 : vector<4x1xf32>
    %115 = arith.mulf %110, %110 : vector<4x128xf32>
    %cst_23 = arith.constant dense<0.000000e+00> : vector<4xf32>
    %116 = vector.multi_reduction <add>, %115, %cst_23 [1] : vector<4x128xf32> to vector<4xf32>
    %117 = vector.shape_cast %116 : vector<4xf32> to vector<4x1xf32>
    %cst_24 = arith.constant 1.250000e-02 : f32
    %118 = vector.broadcast %cst_24 : f32 to vector<4x1xf32>
    %119 = arith.mulf %117, %118 : vector<4x1xf32>
    %120 = arith.mulf %114, %114 : vector<4x1xf32>
    %121 = arith.subf %119, %120 : vector<4x1xf32>
    %cst_25 = arith.constant 9.99999974E-6 : f32
    %122 = vector.broadcast %cst_25 : f32 to vector<4x1xf32>
    %123 = arith.addf %121, %122 : vector<4x1xf32>
    %124 = math.rsqrt %123 : vector<4x1xf32>
    %125 = arith.mulf %107, %124 : vector<4x1xf32>
    %126 = vector.broadcast %114 : vector<4x1xf32> to vector<4x128xf32>
    %127 = arith.subf %106, %126 : vector<4x128xf32>
    %128 = vector.broadcast %125 : vector<4x1xf32> to vector<4x128xf32>
    %129 = arith.mulf %127, %128 : vector<4x128xf32>
    %130 = vector.broadcast %108 : vector<4x1xf32> to vector<4x128xf32>
    %131 = arith.addf %129, %130 : vector<4x128xf32>
    %cst_26 = arith.constant 0.000000e+00 : f32
    %132 = vector.broadcast %cst_26 : f32 to vector<4x128xf32>
    %133 = arith.maximumf %131, %132 : vector<4x128xf32>
    %134 = vector.broadcast %26 : vector<1x128xf32> to vector<4x128xf32>
    %135 = arith.mulf %133, %134 : vector<4x128xf32>
    %136 = vector.extract_strided_slice %55 {offsets = [18, 0], sizes = [24, 4], strides = [1, 1]} : vector<78x8xf32> to vector<24x4xf32>
    %cst_27 = arith.constant dense<0.000000e+00> : vector<24x128xf32>
    %137 = tpu.matmul %136, %135, %cst_27 {dimension_numbers = #tpu.dot_dimension_numbers<[1], [0], [0], [1], [0, 0, 1, 1], [], []>} : vector<24x4xf32>, vector<4x128xf32>, vector<24x128xf32> -> vector<24x128xf32>
    %138 = vector.extract_strided_slice %137 {offsets = [0, 0], sizes = [8, 128], strides = [1, 1]} : vector<24x128xf32> to vector<8x128xf32>
    %cst_28 = arith.constant dense<0.000000e+00> : vector<8x128xf32>
    %139 = tpu.matmul %138, %49, %cst_28 {dimension_numbers = #tpu.dot_dimension_numbers<[1], [0], [0], [1], [0, 0, 1, 1], [], []>} : vector<8x128xf32>, vector<128x128xf32>, vector<8x128xf32> -> vector<8x128xf32>
    %140 = vector.extract_strided_slice %137 {offsets = [8, 0], sizes = [8, 128], strides = [1, 1]} : vector<24x128xf32> to vector<8x128xf32>
    %141 = arith.addf %139, %140 : vector<8x128xf32>
    %142 = vector.extract_strided_slice %137 {offsets = [16, 0], sizes = [8, 128], strides = [1, 1]} : vector<24x128xf32> to vector<8x128xf32>
    %cst_29 = arith.constant dense<0.000000e+00> : vector<8x128xf32>
    %143 = tpu.matmul %142, %54, %cst_29 {dimension_numbers = #tpu.dot_dimension_numbers<[1], [0], [0], [1], [0, 0, 1, 1], [], []>} : vector<8x128xf32>, vector<128x128xf32>, vector<8x128xf32> -> vector<8x128xf32>
    %144 = arith.addf %141, %143 : vector<8x128xf32>
    %145 = vector.extract_strided_slice %56 {offsets = [0, 4], sizes = [8, 1], strides = [1, 1]} : vector<12x8xf32> to vector<8x1xf32>
    %146 = vector.extract_strided_slice %56 {offsets = [0, 5], sizes = [8, 1], strides = [1, 1]} : vector<12x8xf32> to vector<8x1xf32>
    %147 = vector.broadcast %34 : vector<1x128xf32> to vector<8x128xf32>
    %148 = arith.mulf %144, %147 : vector<8x128xf32>
    %cst_30 = arith.constant dense<0.000000e+00> : vector<8xf32>
    %149 = vector.multi_reduction <add>, %148, %cst_30 [1] : vector<8x128xf32> to vector<8xf32>
    %150 = vector.shape_cast %149 : vector<8xf32> to vector<8x1xf32>
    %cst_31 = arith.constant 1.562500e-02 : f32
    %151 = vector.broadcast %cst_31 : f32 to vector<8x1xf32>
    %152 = arith.mulf %150, %151 : vector<8x1xf32>
    %153 = arith.mulf %148, %148 : vector<8x128xf32>
    %cst_32 = arith.constant dense<0.000000e+00> : vector<8xf32>
    %154 = vector.multi_reduction <add>, %153, %cst_32 [1] : vector<8x128xf32> to vector<8xf32>
    %155 = vector.shape_cast %154 : vector<8xf32> to vector<8x1xf32>
    %cst_33 = arith.constant 1.562500e-02 : f32
    %156 = vector.broadcast %cst_33 : f32 to vector<8x1xf32>
    %157 = arith.mulf %155, %156 : vector<8x1xf32>
    %158 = arith.mulf %152, %152 : vector<8x1xf32>
    %159 = arith.subf %157, %158 : vector<8x1xf32>
    %cst_34 = arith.constant 9.99999974E-6 : f32
    %160 = vector.broadcast %cst_34 : f32 to vector<8x1xf32>
    %161 = arith.addf %159, %160 : vector<8x1xf32>
    %162 = math.rsqrt %161 : vector<8x1xf32>
    %163 = arith.mulf %145, %162 : vector<8x1xf32>
    %164 = vector.broadcast %152 : vector<8x1xf32> to vector<8x128xf32>
    %165 = arith.subf %144, %164 : vector<8x128xf32>
    %166 = vector.broadcast %163 : vector<8x1xf32> to vector<8x128xf32>
    %167 = arith.mulf %165, %166 : vector<8x128xf32>
    %168 = vector.broadcast %146 : vector<8x1xf32> to vector<8x128xf32>
    %169 = arith.addf %167, %168 : vector<8x128xf32>
    %cst_35 = arith.constant 0.000000e+00 : f32
    %170 = vector.broadcast %cst_35 : f32 to vector<8x128xf32>
    %171 = arith.maximumf %169, %170 : vector<8x128xf32>
    %172 = vector.broadcast %34 : vector<1x128xf32> to vector<8x128xf32>
    %173 = arith.mulf %171, %172 : vector<8x128xf32>
    %174 = vector.extract_strided_slice %55 {offsets = [42, 0], sizes = [36, 8], strides = [1, 1]} : vector<78x8xf32> to vector<36x8xf32>
    %cst_36 = arith.constant dense<0.000000e+00> : vector<36x128xf32>
    %175 = tpu.matmul %174, %173, %cst_36 {dimension_numbers = #tpu.dot_dimension_numbers<[1], [0], [0], [1], [0, 0, 1, 1], [], []>} : vector<36x8xf32>, vector<8x128xf32>, vector<36x128xf32> -> vector<36x128xf32>
    %176 = vector.extract_strided_slice %175 {offsets = [0, 0], sizes = [12, 128], strides = [1, 1]} : vector<36x128xf32> to vector<12x128xf32>
    %cst_37 = arith.constant dense<0.000000e+00> : vector<12x128xf32>
    %177 = tpu.matmul %176, %49, %cst_37 {dimension_numbers = #tpu.dot_dimension_numbers<[1], [0], [0], [1], [0, 0, 1, 1], [], []>} : vector<12x128xf32>, vector<128x128xf32>, vector<12x128xf32> -> vector<12x128xf32>
    %178 = vector.extract_strided_slice %175 {offsets = [12, 0], sizes = [12, 128], strides = [1, 1]} : vector<36x128xf32> to vector<12x128xf32>
    %179 = arith.addf %177, %178 : vector<12x128xf32>
    %180 = vector.extract_strided_slice %175 {offsets = [24, 0], sizes = [12, 128], strides = [1, 1]} : vector<36x128xf32> to vector<12x128xf32>
    %cst_38 = arith.constant dense<0.000000e+00> : vector<12x128xf32>
    %181 = tpu.matmul %180, %54, %cst_38 {dimension_numbers = #tpu.dot_dimension_numbers<[1], [0], [0], [1], [0, 0, 1, 1], [], []>} : vector<12x128xf32>, vector<128x128xf32>, vector<12x128xf32> -> vector<12x128xf32>
    %182 = arith.addf %179, %181 : vector<12x128xf32>
    %183 = vector.extract_strided_slice %56 {offsets = [0, 6], sizes = [12, 1], strides = [1, 1]} : vector<12x8xf32> to vector<12x1xf32>
    %184 = vector.extract_strided_slice %56 {offsets = [0, 7], sizes = [12, 1], strides = [1, 1]} : vector<12x8xf32> to vector<12x1xf32>
    %185 = vector.broadcast %42 : vector<1x128xf32> to vector<12x128xf32>
    %186 = arith.mulf %182, %185 : vector<12x128xf32>
    %cst_39 = arith.constant dense<0.000000e+00> : vector<12xf32>
    %187 = vector.multi_reduction <add>, %186, %cst_39 [1] : vector<12x128xf32> to vector<12xf32>
    %188 = vector.shape_cast %187 : vector<12xf32> to vector<12x1xf32>
    %cst_40 = arith.constant 0.020833334 : f32
    %189 = vector.broadcast %cst_40 : f32 to vector<12x1xf32>
    %190 = arith.mulf %188, %189 : vector<12x1xf32>
    %191 = arith.mulf %186, %186 : vector<12x128xf32>
    %cst_41 = arith.constant dense<0.000000e+00> : vector<12xf32>
    %192 = vector.multi_reduction <add>, %191, %cst_41 [1] : vector<12x128xf32> to vector<12xf32>
    %193 = vector.shape_cast %192 : vector<12xf32> to vector<12x1xf32>
    %cst_42 = arith.constant 0.020833334 : f32
    %194 = vector.broadcast %cst_42 : f32 to vector<12x1xf32>
    %195 = arith.mulf %193, %194 : vector<12x1xf32>
    %196 = arith.mulf %190, %190 : vector<12x1xf32>
    %197 = arith.subf %195, %196 : vector<12x1xf32>
    %cst_43 = arith.constant 9.99999974E-6 : f32
    %198 = vector.broadcast %cst_43 : f32 to vector<12x1xf32>
    %199 = arith.addf %197, %198 : vector<12x1xf32>
    %200 = math.rsqrt %199 : vector<12x1xf32>
    %201 = arith.mulf %183, %200 : vector<12x1xf32>
    %202 = vector.broadcast %190 : vector<12x1xf32> to vector<12x128xf32>
    %203 = arith.subf %182, %202 : vector<12x128xf32>
    %204 = vector.broadcast %201 : vector<12x1xf32> to vector<12x128xf32>
    %205 = arith.mulf %203, %204 : vector<12x128xf32>
    %206 = vector.broadcast %184 : vector<12x1xf32> to vector<12x128xf32>
    %207 = arith.addf %205, %206 : vector<12x128xf32>
    %cst_44 = arith.constant 0.000000e+00 : f32
    %208 = vector.broadcast %cst_44 : f32 to vector<12x128xf32>
    %209 = arith.maximumf %207, %208 : vector<12x128xf32>
    %210 = vector.broadcast %42 : vector<1x128xf32> to vector<12x128xf32>
    %211 = arith.mulf %209, %210 : vector<12x128xf32>
    %212 = tpu.iota {dimensions = array<i32: 1>} : vector<2x128xi32>
    %213 = tpu.iota {dimensions = array<i32: 0>} : vector<2x128xi32>
    %c48_i32 = arith.constant 48 : i32
    %214 = vector.broadcast %c48_i32 : i32 to vector<2x128xi32>
    %215 = arith.muli %213, %214 : vector<2x128xi32>
    %216 = arith.cmpi sge, %212, %215 : vector<2x128xi32>
    %c48_i32_45 = arith.constant 48 : i32
    %217 = vector.broadcast %c48_i32_45 : i32 to vector<2x128xi32>
    %218 = arith.addi %215, %217 : vector<2x128xi32>
    %219 = arith.cmpi slt, %212, %218 : vector<2x128xi32>
    %220 = arith.andi %216, %219 : vector<2x128xi1>
    %221 = arith.extui %220 : vector<2x128xi1> to vector<2x128xi32>
    %222 = arith.sitofp %221 : vector<2x128xi32> to vector<2x128xf32>
    %223 = tpu.iota {dimensions = array<i32: 1>} : vector<1x12xi32>
    %cst_46 = arith.constant 0.000000e+00 : f32
    %224 = vector.broadcast %cst_46 : f32 to vector<2x12xf32>
    %c0_47 = arith.constant 0 : index
    %c0_48 = arith.constant 0 : index
    %225 = vector.load %arg3[%c0_47, %c0_48] : memref<12x1536xf32, #tpu.memory_space<vmem>>, vector<12x128xf32>
    %226 = arith.mulf %225, %211 : vector<12x128xf32>
    %cst_49 = arith.constant dense<0.000000e+00> : vector<128xf32>
    %227 = vector.multi_reduction <add>, %226, %cst_49 [0] : vector<12x128xf32> to vector<128xf32>
    %228 = vector.shape_cast %227 : vector<128xf32> to vector<1x128xf32>
    %229 = vector.broadcast %228 : vector<1x128xf32> to vector<2x128xf32>
    %230 = arith.mulf %222, %229 : vector<2x128xf32>
    %cst_50 = arith.constant dense<0.000000e+00> : vector<2xf32>
    %231 = vector.multi_reduction <add>, %230, %cst_50 [1] : vector<2x128xf32> to vector<2xf32>
    %232 = vector.shape_cast %231 : vector<2xf32> to vector<2x1xf32>
    %c0_51 = arith.constant 0 : index
    %233 = memref.load %arg4[%c0_51] : memref<12xf32, #tpu.memory_space<smem>>
    %234 = vector.broadcast %233 : f32 to vector<2x1xf32>
    %235 = arith.addf %232, %234 : vector<2x1xf32>
    %c0_i32_52 = arith.constant 0 : i32
    %236 = vector.broadcast %c0_i32_52 : i32 to vector<1x12xi32>
    %237 = arith.cmpi eq, %223, %236 : vector<1x12xi32>
    %238 = arith.extui %237 : vector<1x12xi1> to vector<1x12xi32>
    %239 = arith.sitofp %238 : vector<1x12xi32> to vector<1x12xf32>
    %240 = vector.broadcast %235 : vector<2x1xf32> to vector<2x12xf32>
    %241 = vector.broadcast %239 : vector<1x12xf32> to vector<2x12xf32>
    %242 = arith.mulf %240, %241 : vector<2x12xf32>
    %243 = arith.addf %224, %242 : vector<2x12xf32>
    %c0_53 = arith.constant 0 : index
    %c128 = arith.constant 128 : index
    %244 = vector.load %arg3[%c0_53, %c128] : memref<12x1536xf32, #tpu.memory_space<vmem>>, vector<12x128xf32>
    %245 = arith.mulf %244, %211 : vector<12x128xf32>
    %cst_54 = arith.constant dense<0.000000e+00> : vector<128xf32>
    %246 = vector.multi_reduction <add>, %245, %cst_54 [0] : vector<12x128xf32> to vector<128xf32>
    %247 = vector.shape_cast %246 : vector<128xf32> to vector<1x128xf32>
    %248 = vector.broadcast %247 : vector<1x128xf32> to vector<2x128xf32>
    %249 = arith.mulf %222, %248 : vector<2x128xf32>
    %cst_55 = arith.constant dense<0.000000e+00> : vector<2xf32>
    %250 = vector.multi_reduction <add>, %249, %cst_55 [1] : vector<2x128xf32> to vector<2xf32>
    %251 = vector.shape_cast %250 : vector<2xf32> to vector<2x1xf32>
    %c1 = arith.constant 1 : index
    %252 = memref.load %arg4[%c1] : memref<12xf32, #tpu.memory_space<smem>>
    %253 = vector.broadcast %252 : f32 to vector<2x1xf32>
    %254 = arith.addf %251, %253 : vector<2x1xf32>
    %c1_i32_56 = arith.constant 1 : i32
    %255 = vector.broadcast %c1_i32_56 : i32 to vector<1x12xi32>
    %256 = arith.cmpi eq, %223, %255 : vector<1x12xi32>
    %257 = arith.extui %256 : vector<1x12xi1> to vector<1x12xi32>
    %258 = arith.sitofp %257 : vector<1x12xi32> to vector<1x12xf32>
    %259 = vector.broadcast %254 : vector<2x1xf32> to vector<2x12xf32>
    %260 = vector.broadcast %258 : vector<1x12xf32> to vector<2x12xf32>
    %261 = arith.mulf %259, %260 : vector<2x12xf32>
    %262 = arith.addf %243, %261 : vector<2x12xf32>
    %c0_57 = arith.constant 0 : index
    %c256 = arith.constant 256 : index
    %263 = vector.load %arg3[%c0_57, %c256] : memref<12x1536xf32, #tpu.memory_space<vmem>>, vector<12x128xf32>
    %264 = arith.mulf %263, %211 : vector<12x128xf32>
    %cst_58 = arith.constant dense<0.000000e+00> : vector<128xf32>
    %265 = vector.multi_reduction <add>, %264, %cst_58 [0] : vector<12x128xf32> to vector<128xf32>
    %266 = vector.shape_cast %265 : vector<128xf32> to vector<1x128xf32>
    %267 = vector.broadcast %266 : vector<1x128xf32> to vector<2x128xf32>
    %268 = arith.mulf %222, %267 : vector<2x128xf32>
    %cst_59 = arith.constant dense<0.000000e+00> : vector<2xf32>
    %269 = vector.multi_reduction <add>, %268, %cst_59 [1] : vector<2x128xf32> to vector<2xf32>
    %270 = vector.shape_cast %269 : vector<2xf32> to vector<2x1xf32>
    %c2 = arith.constant 2 : index
    %271 = memref.load %arg4[%c2] : memref<12xf32, #tpu.memory_space<smem>>
    %272 = vector.broadcast %271 : f32 to vector<2x1xf32>
    %273 = arith.addf %270, %272 : vector<2x1xf32>
    %c2_i32_60 = arith.constant 2 : i32
    %274 = vector.broadcast %c2_i32_60 : i32 to vector<1x12xi32>
    %275 = arith.cmpi eq, %223, %274 : vector<1x12xi32>
    %276 = arith.extui %275 : vector<1x12xi1> to vector<1x12xi32>
    %277 = arith.sitofp %276 : vector<1x12xi32> to vector<1x12xf32>
    %278 = vector.broadcast %273 : vector<2x1xf32> to vector<2x12xf32>
    %279 = vector.broadcast %277 : vector<1x12xf32> to vector<2x12xf32>
    %280 = arith.mulf %278, %279 : vector<2x12xf32>
    %281 = arith.addf %262, %280 : vector<2x12xf32>
    %c0_61 = arith.constant 0 : index
    %c384 = arith.constant 384 : index
    %282 = vector.load %arg3[%c0_61, %c384] : memref<12x1536xf32, #tpu.memory_space<vmem>>, vector<12x128xf32>
    %283 = arith.mulf %282, %211 : vector<12x128xf32>
    %cst_62 = arith.constant dense<0.000000e+00> : vector<128xf32>
    %284 = vector.multi_reduction <add>, %283, %cst_62 [0] : vector<12x128xf32> to vector<128xf32>
    %285 = vector.shape_cast %284 : vector<128xf32> to vector<1x128xf32>
    %286 = vector.broadcast %285 : vector<1x128xf32> to vector<2x128xf32>
    %287 = arith.mulf %222, %286 : vector<2x128xf32>
    %cst_63 = arith.constant dense<0.000000e+00> : vector<2xf32>
    %288 = vector.multi_reduction <add>, %287, %cst_63 [1] : vector<2x128xf32> to vector<2xf32>
    %289 = vector.shape_cast %288 : vector<2xf32> to vector<2x1xf32>
    %c3 = arith.constant 3 : index
    %290 = memref.load %arg4[%c3] : memref<12xf32, #tpu.memory_space<smem>>
    %291 = vector.broadcast %290 : f32 to vector<2x1xf32>
    %292 = arith.addf %289, %291 : vector<2x1xf32>
    %c3_i32_64 = arith.constant 3 : i32
    %293 = vector.broadcast %c3_i32_64 : i32 to vector<1x12xi32>
    %294 = arith.cmpi eq, %223, %293 : vector<1x12xi32>
    %295 = arith.extui %294 : vector<1x12xi1> to vector<1x12xi32>
    %296 = arith.sitofp %295 : vector<1x12xi32> to vector<1x12xf32>
    %297 = vector.broadcast %292 : vector<2x1xf32> to vector<2x12xf32>
    %298 = vector.broadcast %296 : vector<1x12xf32> to vector<2x12xf32>
    %299 = arith.mulf %297, %298 : vector<2x12xf32>
    %300 = arith.addf %281, %299 : vector<2x12xf32>
    %c0_65 = arith.constant 0 : index
    %c512 = arith.constant 512 : index
    %301 = vector.load %arg3[%c0_65, %c512] : memref<12x1536xf32, #tpu.memory_space<vmem>>, vector<12x128xf32>
    %302 = arith.mulf %301, %211 : vector<12x128xf32>
    %cst_66 = arith.constant dense<0.000000e+00> : vector<128xf32>
    %303 = vector.multi_reduction <add>, %302, %cst_66 [0] : vector<12x128xf32> to vector<128xf32>
    %304 = vector.shape_cast %303 : vector<128xf32> to vector<1x128xf32>
    %305 = vector.broadcast %304 : vector<1x128xf32> to vector<2x128xf32>
    %306 = arith.mulf %222, %305 : vector<2x128xf32>
    %cst_67 = arith.constant dense<0.000000e+00> : vector<2xf32>
    %307 = vector.multi_reduction <add>, %306, %cst_67 [1] : vector<2x128xf32> to vector<2xf32>
    %308 = vector.shape_cast %307 : vector<2xf32> to vector<2x1xf32>
    %c4 = arith.constant 4 : index
    %309 = memref.load %arg4[%c4] : memref<12xf32, #tpu.memory_space<smem>>
    %310 = vector.broadcast %309 : f32 to vector<2x1xf32>
    %311 = arith.addf %308, %310 : vector<2x1xf32>
    %c4_i32 = arith.constant 4 : i32
    %312 = vector.broadcast %c4_i32 : i32 to vector<1x12xi32>
    %313 = arith.cmpi eq, %223, %312 : vector<1x12xi32>
    %314 = arith.extui %313 : vector<1x12xi1> to vector<1x12xi32>
    %315 = arith.sitofp %314 : vector<1x12xi32> to vector<1x12xf32>
    %316 = vector.broadcast %311 : vector<2x1xf32> to vector<2x12xf32>
    %317 = vector.broadcast %315 : vector<1x12xf32> to vector<2x12xf32>
    %318 = arith.mulf %316, %317 : vector<2x12xf32>
    %319 = arith.addf %300, %318 : vector<2x12xf32>
    %c0_68 = arith.constant 0 : index
    %c640 = arith.constant 640 : index
    %320 = vector.load %arg3[%c0_68, %c640] : memref<12x1536xf32, #tpu.memory_space<vmem>>, vector<12x128xf32>
    %321 = arith.mulf %320, %211 : vector<12x128xf32>
    %cst_69 = arith.constant dense<0.000000e+00> : vector<128xf32>
    %322 = vector.multi_reduction <add>, %321, %cst_69 [0] : vector<12x128xf32> to vector<128xf32>
    %323 = vector.shape_cast %322 : vector<128xf32> to vector<1x128xf32>
    %324 = vector.broadcast %323 : vector<1x128xf32> to vector<2x128xf32>
    %325 = arith.mulf %222, %324 : vector<2x128xf32>
    %cst_70 = arith.constant dense<0.000000e+00> : vector<2xf32>
    %326 = vector.multi_reduction <add>, %325, %cst_70 [1] : vector<2x128xf32> to vector<2xf32>
    %327 = vector.shape_cast %326 : vector<2xf32> to vector<2x1xf32>
    %c5 = arith.constant 5 : index
    %328 = memref.load %arg4[%c5] : memref<12xf32, #tpu.memory_space<smem>>
    %329 = vector.broadcast %328 : f32 to vector<2x1xf32>
    %330 = arith.addf %327, %329 : vector<2x1xf32>
    %c5_i32 = arith.constant 5 : i32
    %331 = vector.broadcast %c5_i32 : i32 to vector<1x12xi32>
    %332 = arith.cmpi eq, %223, %331 : vector<1x12xi32>
    %333 = arith.extui %332 : vector<1x12xi1> to vector<1x12xi32>
    %334 = arith.sitofp %333 : vector<1x12xi32> to vector<1x12xf32>
    %335 = vector.broadcast %330 : vector<2x1xf32> to vector<2x12xf32>
    %336 = vector.broadcast %334 : vector<1x12xf32> to vector<2x12xf32>
    %337 = arith.mulf %335, %336 : vector<2x12xf32>
    %338 = arith.addf %319, %337 : vector<2x12xf32>
    %c0_71 = arith.constant 0 : index
    %c768 = arith.constant 768 : index
    %339 = vector.load %arg3[%c0_71, %c768] : memref<12x1536xf32, #tpu.memory_space<vmem>>, vector<12x128xf32>
    %340 = arith.mulf %339, %211 : vector<12x128xf32>
    %cst_72 = arith.constant dense<0.000000e+00> : vector<128xf32>
    %341 = vector.multi_reduction <add>, %340, %cst_72 [0] : vector<12x128xf32> to vector<128xf32>
    %342 = vector.shape_cast %341 : vector<128xf32> to vector<1x128xf32>
    %343 = vector.broadcast %342 : vector<1x128xf32> to vector<2x128xf32>
    %344 = arith.mulf %222, %343 : vector<2x128xf32>
    %cst_73 = arith.constant dense<0.000000e+00> : vector<2xf32>
    %345 = vector.multi_reduction <add>, %344, %cst_73 [1] : vector<2x128xf32> to vector<2xf32>
    %346 = vector.shape_cast %345 : vector<2xf32> to vector<2x1xf32>
    %c6 = arith.constant 6 : index
    %347 = memref.load %arg4[%c6] : memref<12xf32, #tpu.memory_space<smem>>
    %348 = vector.broadcast %347 : f32 to vector<2x1xf32>
    %349 = arith.addf %346, %348 : vector<2x1xf32>
    %c6_i32 = arith.constant 6 : i32
    %350 = vector.broadcast %c6_i32 : i32 to vector<1x12xi32>
    %351 = arith.cmpi eq, %223, %350 : vector<1x12xi32>
    %352 = arith.extui %351 : vector<1x12xi1> to vector<1x12xi32>
    %353 = arith.sitofp %352 : vector<1x12xi32> to vector<1x12xf32>
    %354 = vector.broadcast %349 : vector<2x1xf32> to vector<2x12xf32>
    %355 = vector.broadcast %353 : vector<1x12xf32> to vector<2x12xf32>
    %356 = arith.mulf %354, %355 : vector<2x12xf32>
    %357 = arith.addf %338, %356 : vector<2x12xf32>
    %c0_74 = arith.constant 0 : index
    %c896 = arith.constant 896 : index
    %358 = vector.load %arg3[%c0_74, %c896] : memref<12x1536xf32, #tpu.memory_space<vmem>>, vector<12x128xf32>
    %359 = arith.mulf %358, %211 : vector<12x128xf32>
    %cst_75 = arith.constant dense<0.000000e+00> : vector<128xf32>
    %360 = vector.multi_reduction <add>, %359, %cst_75 [0] : vector<12x128xf32> to vector<128xf32>
    %361 = vector.shape_cast %360 : vector<128xf32> to vector<1x128xf32>
    %362 = vector.broadcast %361 : vector<1x128xf32> to vector<2x128xf32>
    %363 = arith.mulf %222, %362 : vector<2x128xf32>
    %cst_76 = arith.constant dense<0.000000e+00> : vector<2xf32>
    %364 = vector.multi_reduction <add>, %363, %cst_76 [1] : vector<2x128xf32> to vector<2xf32>
    %365 = vector.shape_cast %364 : vector<2xf32> to vector<2x1xf32>
    %c7 = arith.constant 7 : index
    %366 = memref.load %arg4[%c7] : memref<12xf32, #tpu.memory_space<smem>>
    %367 = vector.broadcast %366 : f32 to vector<2x1xf32>
    %368 = arith.addf %365, %367 : vector<2x1xf32>
    %c7_i32 = arith.constant 7 : i32
    %369 = vector.broadcast %c7_i32 : i32 to vector<1x12xi32>
    %370 = arith.cmpi eq, %223, %369 : vector<1x12xi32>
    %371 = arith.extui %370 : vector<1x12xi1> to vector<1x12xi32>
    %372 = arith.sitofp %371 : vector<1x12xi32> to vector<1x12xf32>
    %373 = vector.broadcast %368 : vector<2x1xf32> to vector<2x12xf32>
    %374 = vector.broadcast %372 : vector<1x12xf32> to vector<2x12xf32>
    %375 = arith.mulf %373, %374 : vector<2x12xf32>
    %376 = arith.addf %357, %375 : vector<2x12xf32>
    %c0_77 = arith.constant 0 : index
    %c1024 = arith.constant 1024 : index
    %377 = vector.load %arg3[%c0_77, %c1024] : memref<12x1536xf32, #tpu.memory_space<vmem>>, vector<12x128xf32>
    %378 = arith.mulf %377, %211 : vector<12x128xf32>
    %cst_78 = arith.constant dense<0.000000e+00> : vector<128xf32>
    %379 = vector.multi_reduction <add>, %378, %cst_78 [0] : vector<12x128xf32> to vector<128xf32>
    %380 = vector.shape_cast %379 : vector<128xf32> to vector<1x128xf32>
    %381 = vector.broadcast %380 : vector<1x128xf32> to vector<2x128xf32>
    %382 = arith.mulf %222, %381 : vector<2x128xf32>
    %cst_79 = arith.constant dense<0.000000e+00> : vector<2xf32>
    %383 = vector.multi_reduction <add>, %382, %cst_79 [1] : vector<2x128xf32> to vector<2xf32>
    %384 = vector.shape_cast %383 : vector<2xf32> to vector<2x1xf32>
    %c8 = arith.constant 8 : index
    %385 = memref.load %arg4[%c8] : memref<12xf32, #tpu.memory_space<smem>>
    %386 = vector.broadcast %385 : f32 to vector<2x1xf32>
    %387 = arith.addf %384, %386 : vector<2x1xf32>
    %c8_i32_80 = arith.constant 8 : i32
    %388 = vector.broadcast %c8_i32_80 : i32 to vector<1x12xi32>
    %389 = arith.cmpi eq, %223, %388 : vector<1x12xi32>
    %390 = arith.extui %389 : vector<1x12xi1> to vector<1x12xi32>
    %391 = arith.sitofp %390 : vector<1x12xi32> to vector<1x12xf32>
    %392 = vector.broadcast %387 : vector<2x1xf32> to vector<2x12xf32>
    %393 = vector.broadcast %391 : vector<1x12xf32> to vector<2x12xf32>
    %394 = arith.mulf %392, %393 : vector<2x12xf32>
    %395 = arith.addf %376, %394 : vector<2x12xf32>
    %c0_81 = arith.constant 0 : index
    %c1152 = arith.constant 1152 : index
    %396 = vector.load %arg3[%c0_81, %c1152] : memref<12x1536xf32, #tpu.memory_space<vmem>>, vector<12x128xf32>
    %397 = arith.mulf %396, %211 : vector<12x128xf32>
    %cst_82 = arith.constant dense<0.000000e+00> : vector<128xf32>
    %398 = vector.multi_reduction <add>, %397, %cst_82 [0] : vector<12x128xf32> to vector<128xf32>
    %399 = vector.shape_cast %398 : vector<128xf32> to vector<1x128xf32>
    %400 = vector.broadcast %399 : vector<1x128xf32> to vector<2x128xf32>
    %401 = arith.mulf %222, %400 : vector<2x128xf32>
    %cst_83 = arith.constant dense<0.000000e+00> : vector<2xf32>
    %402 = vector.multi_reduction <add>, %401, %cst_83 [1] : vector<2x128xf32> to vector<2xf32>
    %403 = vector.shape_cast %402 : vector<2xf32> to vector<2x1xf32>
    %c9 = arith.constant 9 : index
    %404 = memref.load %arg4[%c9] : memref<12xf32, #tpu.memory_space<smem>>
    %405 = vector.broadcast %404 : f32 to vector<2x1xf32>
    %406 = arith.addf %403, %405 : vector<2x1xf32>
    %c9_i32_84 = arith.constant 9 : i32
    %407 = vector.broadcast %c9_i32_84 : i32 to vector<1x12xi32>
    %408 = arith.cmpi eq, %223, %407 : vector<1x12xi32>
    %409 = arith.extui %408 : vector<1x12xi1> to vector<1x12xi32>
    %410 = arith.sitofp %409 : vector<1x12xi32> to vector<1x12xf32>
    %411 = vector.broadcast %406 : vector<2x1xf32> to vector<2x12xf32>
    %412 = vector.broadcast %410 : vector<1x12xf32> to vector<2x12xf32>
    %413 = arith.mulf %411, %412 : vector<2x12xf32>
    %414 = arith.addf %395, %413 : vector<2x12xf32>
    %c0_85 = arith.constant 0 : index
    %c1280 = arith.constant 1280 : index
    %415 = vector.load %arg3[%c0_85, %c1280] : memref<12x1536xf32, #tpu.memory_space<vmem>>, vector<12x128xf32>
    %416 = arith.mulf %415, %211 : vector<12x128xf32>
    %cst_86 = arith.constant dense<0.000000e+00> : vector<128xf32>
    %417 = vector.multi_reduction <add>, %416, %cst_86 [0] : vector<12x128xf32> to vector<128xf32>
    %418 = vector.shape_cast %417 : vector<128xf32> to vector<1x128xf32>
    %419 = vector.broadcast %418 : vector<1x128xf32> to vector<2x128xf32>
    %420 = arith.mulf %222, %419 : vector<2x128xf32>
    %cst_87 = arith.constant dense<0.000000e+00> : vector<2xf32>
    %421 = vector.multi_reduction <add>, %420, %cst_87 [1] : vector<2x128xf32> to vector<2xf32>
    %422 = vector.shape_cast %421 : vector<2xf32> to vector<2x1xf32>
    %c10 = arith.constant 10 : index
    %423 = memref.load %arg4[%c10] : memref<12xf32, #tpu.memory_space<smem>>
    %424 = vector.broadcast %423 : f32 to vector<2x1xf32>
    %425 = arith.addf %422, %424 : vector<2x1xf32>
    %c10_i32_88 = arith.constant 10 : i32
    %426 = vector.broadcast %c10_i32_88 : i32 to vector<1x12xi32>
    %427 = arith.cmpi eq, %223, %426 : vector<1x12xi32>
    %428 = arith.extui %427 : vector<1x12xi1> to vector<1x12xi32>
    %429 = arith.sitofp %428 : vector<1x12xi32> to vector<1x12xf32>
    %430 = vector.broadcast %425 : vector<2x1xf32> to vector<2x12xf32>
    %431 = vector.broadcast %429 : vector<1x12xf32> to vector<2x12xf32>
    %432 = arith.mulf %430, %431 : vector<2x12xf32>
    %433 = arith.addf %414, %432 : vector<2x12xf32>
    %c0_89 = arith.constant 0 : index
    %c1408 = arith.constant 1408 : index
    %434 = vector.load %arg3[%c0_89, %c1408] : memref<12x1536xf32, #tpu.memory_space<vmem>>, vector<12x128xf32>
    %435 = arith.mulf %434, %211 : vector<12x128xf32>
    %cst_90 = arith.constant dense<0.000000e+00> : vector<128xf32>
    %436 = vector.multi_reduction <add>, %435, %cst_90 [0] : vector<12x128xf32> to vector<128xf32>
    %437 = vector.shape_cast %436 : vector<128xf32> to vector<1x128xf32>
    %438 = vector.broadcast %437 : vector<1x128xf32> to vector<2x128xf32>
    %439 = arith.mulf %222, %438 : vector<2x128xf32>
    %cst_91 = arith.constant dense<0.000000e+00> : vector<2xf32>
    %440 = vector.multi_reduction <add>, %439, %cst_91 [1] : vector<2x128xf32> to vector<2xf32>
    %441 = vector.shape_cast %440 : vector<2xf32> to vector<2x1xf32>
    %c11 = arith.constant 11 : index
    %442 = memref.load %arg4[%c11] : memref<12xf32, #tpu.memory_space<smem>>
    %443 = vector.broadcast %442 : f32 to vector<2x1xf32>
    %444 = arith.addf %441, %443 : vector<2x1xf32>
    %c11_i32 = arith.constant 11 : i32
    %445 = vector.broadcast %c11_i32 : i32 to vector<1x12xi32>
    %446 = arith.cmpi eq, %223, %445 : vector<1x12xi32>
    %447 = arith.extui %446 : vector<1x12xi1> to vector<1x12xi32>
    %448 = arith.sitofp %447 : vector<1x12xi32> to vector<1x12xf32>
    %449 = vector.broadcast %444 : vector<2x1xf32> to vector<2x12xf32>
    %450 = vector.broadcast %448 : vector<1x12xf32> to vector<2x12xf32>
    %451 = arith.mulf %449, %450 : vector<2x12xf32>
    %452 = arith.addf %433, %451 : vector<2x12xf32>
    %cst_92 = arith.constant dense<0xFF800000> : vector<2xf32>
    %453 = vector.multi_reduction <maximumf>, %452, %cst_92 [1] : vector<2x12xf32> to vector<2xf32>
    %454 = vector.shape_cast %453 : vector<2xf32> to vector<2x1xf32>
    %455 = vector.broadcast %454 : vector<2x1xf32> to vector<2x12xf32>
    %456 = arith.subf %452, %455 : vector<2x12xf32>
    %457 = math.exp %456 : vector<2x12xf32>
    %cst_93 = arith.constant dense<0.000000e+00> : vector<2xf32>
    %458 = vector.multi_reduction <add>, %457, %cst_93 [1] : vector<2x12xf32> to vector<2xf32>
    %459 = vector.shape_cast %458 : vector<2xf32> to vector<2x1xf32>
    %460 = tpu.reciprocal %459 : vector<2x1xf32> -> vector<2x1xf32>
    %461 = vector.broadcast %460 : vector<2x1xf32> to vector<2x12xf32>
    %462 = arith.mulf %457, %461 : vector<2x12xf32>
    %c0_94 = arith.constant 0 : index
    %c0_95 = arith.constant 0 : index
    %463 = vector.load %arg5[%c0_94, %c0_95] : memref<2x12xf32, #tpu.memory_space<vmem>>, vector<2x12xf32>
    tpu.vector_store %arg5[%c0_94, %c0_95], %462 {strides = array<i32>} : memref<2x12xf32, #tpu.memory_space<vmem>>, vector<2x12xf32>,
    return
  }
}

</mosaic_0001>

<bundles_post_ra>
// kernel: tpu_custom_call.1
= control target key start
LH: loop header
LB: loop body
LE: loop exit
PB: predicated region body
PF: predicated region fallthrough
CT: control target
= control target key end

     0   :  { %10 = vsyncpa [#allocation3], 0  ;;  %s3473_s0 = inlined_call_operand.vmem [shape: f32[1,128], index: 0, kind: input, shape index: {}]   ;;  %s3474_s1 = inlined_call_operand.vmem [shape: f32[78,8], index: 1, kind: input, shape index: {}]   ;;  %s3475_s2 = inlined_call_operand.vmem [shape: f32[12,8], index: 2, kind: input, shape index: {}]   ;;  %s3476_s3 = inlined_call_operand.hbm [shape: f32[12,1536], index: 3, kind: input, shape index: {}]   ;;  %s3477_s4 = inlined_call_operand.vmem [shape: f32[12], index: 4, kind: input, shape index: {}]   ;;  %s3478_s5 = inlined_call_operand.hbm [shape: f32[2,12], index: 5, kind: output, shape index: {}]  }
   0x1   :  { %11 = vsyncpa [#allocation5], 0 }
   0x2   :  { %12 = vsyncpa [#allocation4], 0  ;;  %s2368_s18 = smov [#allocation2]   ;;  %s37_s22 = sshll.u32 %s3477_s4, 4  ;;  %s38_s22 = int_to_ptr.vmem [resolvable:$true] %s37_s22 }
   0x3   :  { %s24_s19 = sshll.u32 %s2368_s18, 4  ;;  %s25_s19 = int_to_ptr.vmem [resolvable:$true] %s24_s19 }
   0x4   :  { %s2318_s23 = scalar_lea.vmem %s25_s19, 3072  ;;  %p2323_p1 = scmp.lt.s32.totalorder %s25_s19, %s25_s19 }
   0x5   :  { %p2319_p0 = scmp.ne.s32.totalorder %s25_s19, %s2318_s23  ;;  %p2324_p2 = scmp.lt.s32.totalorder %s2318_s23, %s2318_s23 }
   0x7   :  { %p2325_p3 = por %p2324_p2, %p2323_p1 }
   0x9   :  { %p2326_p4 = pnand %p2325_p3, %p2319_p0 }
   0xb   :  { %2329 = shalt.err (!%p2326_p4)
}
   0xc   :  { %s2369_s24 = smov 1536   ;;  %s2370_s25 = smov 96  }
   0xd   :  { %30 = dma.hbm_to_vmem [thread:$0]  %s3476_s3, 3072, %s25_s19, [#allocation3], %s2369_s24, %s2369_s24, %s2370_s25  }
   0xe   :  { %s2330_s28 = scalar_lea.vmem %s38_s22, 16  ;;  %p2335_p6 = scmp.lt.s32.totalorder %s38_s22, %s38_s22 }
   0xf   :  { %p2331_p5 = scmp.ne.s32.totalorder %s38_s22, %s2330_s28  ;;  %p2336_p7 = scmp.lt.s32.totalorder %s2330_s28, %s2330_s28 }
  0x11   :  { %p2337_p8 = por %p2336_p7, %p2335_p6 }
  0x13   :  { %p2338_p9 = pnand %p2337_p8, %p2331_p5 }
  0x15   :  { %2341 = shalt.err (!%p2338_p9)
}
  0x16   :  { %s2371_s4 = smov [#allocation6]  }
  0x17   :  { %40 = dma.vmem_to_smem %s38_s22, 16, %s2371_s4, [#allocation5]  }
  0x18   :  { %2362 = dma.done.wait [#allocation3], 3072  }
  0x19   :  { %2363 = vsyncadd [#allocation3], 4294964224 }
  0x1a   :  { %2364 = dma.done.wait [#allocation5], 16  }
  0x1b   :  { %2365 = vsyncadd [#allocation5], 4294967280 }
  0x1c   :  { %47 = sfence }
  0x1d   :  { %v2423_v0 = vld [vmem:[%s3474_s1] sm:$0xff]  ;;  %v48_v1 = vlaneseq  ;;  %v2372_v2 = vmov 0   ;;  %v2373_v3 = vmov 0.0   ;;  %vm3479_vm0 = vmmov 0   ;;  %s1302_s27 = sld [smem:[#allocation6]]  ;;  %s2383_s10 = smov [#allocation7]  }
  0x1e   :  { %2285 = vset.pattern.permute.xlu0 %v2372_v2  ;;  %1954 = vmatprep.subr.mxu0 %v2373_v3  ;;  %v3549_v14 = vmov 0  ;;  %v2375_v16 = vmov 1.0   ;;  %v3551_v17 = vmov 0  ;;  %v3557_v22 = vmov 0  ;;  %s1783_s28 = sld [smem:[#allocation6 + $0x2]]  ;;  %s1593_s11 = sshll.u32 %s2383_s10, 4  ;;  %s1594_s11 = int_to_ptr.vmem [resolvable:$true] %s1593_s11 }
  0x1f   :  { %230 = vperm.xlu0 %2285, %v2423_v0   ;;  %v2427_v4 = vand.u32 127, %v48_v1  ;;  %v2429_v5 = vshrl.u32 %v48_v1, 7  ;;  %1989 = vmatprep.subr.mxu1 %v2373_v3  ;;  %v3559_v23 = vmov 0  ;;  %v3561_v25 = vmov 0  ;;  %s1785_s4 = sld [smem:[#allocation6 + $0x3]]  ;;  %s2342_s12 = scalar_lea.vmem %s1594_s11, 32 }
  0x20   :  { %1986 = vmatprep.mubr.msk.f32.mxu0 %vm3479_vm0, %v2373_v3  ;;  %2021 = vmatprep.mubr.msk.f32.mxu1 %vm3479_vm0, %v2373_v3  ;;  %v3563_v27 = vmov 0  ;;  %v3565_v29 = vmov 0  ;;  %v3567_v31 = vmov 0  ;;  %v3569_v33 = vmov 0  ;;  %s3419_s29 = sld [smem:[#allocation6 + $0x4]]  ;;  %p2343_p10 = scmp.ne.s32.totalorder %s1594_s11, %s2342_s12 }
  0x21   :  { %v101_v6 = vadd.s32 120, %v2429_v5  ;;  %v100_v7 = vadd.s32 112, %v2429_v5  ;;  %v2439_v8 = vadd.s32 1, %v2427_v4  ;;  %v99_v9 = vadd.s32 104, %v2429_v5  ;;  %2286 = vset.pattern.permute.xlu1 %v2372_v2  ;;  %s3421_s30 = sld [smem:[#allocation6 + $0x5]]  ;;  %p2347_p11 = scmp.lt.s32.totalorder %s1594_s11, %s1594_s11 }
  0x22   :  { %v98_v10 = vadd.s32 96, %v2429_v5  ;;  %v97_v11 = vadd.s32 88, %v2429_v5  ;;  %v96_v18 = vadd.s32 80, %v2429_v5  ;;  %v95_v26 = vadd.s32 72, %v2429_v5  ;;  %s3425_s3 = sld [smem:[#allocation6 + $0x6]]  ;;  %p2348_p12 = scmp.lt.s32.totalorder %s2342_s12, %s2342_s12 }
  0x23   :  { %v117_v12 = vadd.s32 1, %v101_v6  ;;  %v116_v13 = vadd.s32 1, %v100_v7  ;;  %vm2445_vm1 = vcmp.eq.s32.totalorder %v2439_v8, %v101_v6  ;;  %v115_v15 = vadd.s32 1, %v99_v9  ;;  %s3433_s6 = sld [smem:[#allocation6 + $0x7]] }
  0x24   :  { %v3550_v14 = vsel %vm2445_vm1, 4294967295, %v3549_v14  ;;  %1990 = vmatpush3.msk.msra.mxu1 %vm2445_vm1, %v2375_v16  ;;  %vm2453_vm2 = vcmp.eq.s32.totalorder %v2439_v8, %v100_v7  ;;  %v114_v21 = vadd.s32 1, %v98_v10  ;;  %vm2470_vm5 = vcmp.eq.s32.totalorder %v2439_v8, %v99_v9  ;;  %s3443_s7 = sld [smem:[#allocation6 + $0x8]]  ;;  %p2349_p13 = por %p2348_p12, %p2347_p11 }
  0x25   :  { %v3552_v17 = vsel %vm2453_vm2, 4294967295, %v3551_v17  ;;  %vm2459_vm3 = vcmp.eq.s32.totalorder %v2427_v4, %v117_v12  ;;  %vm2464_vm4 = vcmp.eq.s32.totalorder %v2427_v4, %v116_v13  ;;  %1991 = vmatprep.subr.mxu1 %v2373_v3  ;;  %v3558_v22 = vsel %vm2470_vm5, 4294967295, %v3557_v22  ;;  %s3447_s8 = sld [smem:[#allocation6 + $0xb]] }
  0x26   :  { %1955 = vmatpush3.msk.msra.mxu0 %vm2459_vm3, %v2375_v16  ;;  %1992 = vmatpush3.msk.msra.mxu1 %vm2453_vm2, %v2375_v16  ;;  %vm2482_vm6 = vcmp.eq.s32.totalorder %v2427_v4, %v115_v15  ;;  %v113_v24 = vadd.s32 1, %v97_v11  ;;  %vm2488_vm7 = vcmp.eq.s32.totalorder %v2439_v8, %v98_v10  ;;  %vm2501_vm8 = vcmp.eq.s32.totalorder %v2427_v4, %v114_v21  ;;  %s3452_s9 = sld [smem:[#allocation6 + $0xa]]  ;;  %p2350_p0 = pnand %p2349_p13, %p2343_p10 }
  0x27   :  { %1956 = vmatprep.subr.mxu0 %v2373_v3  ;;  %v3560_v23 = vsel %vm2482_vm6, 4294967295, %v3559_v23  ;;  %1993 = vmatprep.subr.mxu1 %v2373_v3  ;;  %v3562_v25 = vsel %vm2488_vm7, 4294967295, %v3561_v25  ;;  %v3564_v27 = vsel %vm2501_vm8, 4294967295, %v3563_v27  ;;  %v112_v28 = vadd.s32 1, %v96_v18 }
  0x28   :  { %1957 = vmatpush3.msk.msra.mxu0 %vm2464_vm4, %v2375_v16  ;;  %1994 = vmatpush3.msk.msra.mxu1 %vm2470_vm5, %v2375_v16  ;;  %vm2507_vm9 = vcmp.eq.s32.totalorder %v2439_v8, %v97_v11  ;;  %v94_v30 = vadd.s32 64, %v2429_v5  ;;  %vm2520_vm10 = vcmp.eq.s32.totalorder %v2427_v4, %v113_v24  ;;  %v111_v32 = vadd.s32 1, %v95_v26 }
  0x29   :  { %1958 = vmatprep.subr.mxu0 %v2373_v3  ;;  %1995 = vmatprep.subr.mxu1 %v2373_v3  ;;  %v3566_v29 = vsel %vm2507_vm9, 4294967295, %v3565_v29  ;;  %v3568_v31 = vsel %vm2520_vm10, 4294967295, %v3567_v31  ;;  %vm2526_vm11 = vcmp.eq.s32.totalorder %v2439_v8, %v96_v18  ;;  %v93_v34 = vadd.s32 56, %v2429_v5 }
  0x2a   :  { %1959 = vmatpush3.msk.msra.mxu0 %vm2482_vm6, %v2375_v16  ;;  %1996 = vmatpush3.msk.msra.mxu1 %vm2488_vm7, %v2375_v16  ;;  %v3570_v33 = vsel %vm2526_vm11, 4294967295, %v3569_v33  ;;  %vm2539_vm12 = vcmp.eq.s32.totalorder %v2427_v4, %v112_v28  ;;  %v3571_v35 = vmov 0  ;;  %v110_v36 = vadd.s32 1, %v94_v30 }
  0x2b   :  { %1960 = vmatprep.subr.mxu0 %v2373_v3  ;;  %1997 = vmatprep.subr.mxu1 %v2373_v3  ;;  %v3572_v35 = vsel %vm2539_vm12, 4294967295, %v3571_v35  ;;  %vm2545_vm13 = vcmp.eq.s32.totalorder %v2439_v8, %v95_v26  ;;  %v3573_v37 = vmov 0  ;;  %v92_v38 = vadd.s32 48, %v2429_v5 }
  0x2c   :  { %1961 = vmatpush3.msk.msra.mxu0 %vm2501_vm8, %v2375_v16  ;;  %1998 = vmatpush3.msk.msra.mxu1 %vm2507_vm9, %v2375_v16  ;;  %v3574_v37 = vsel %vm2545_vm13, 4294967295, %v3573_v37  ;;  %vm2558_vm14 = vcmp.eq.s32.totalorder %v2427_v4, %v111_v32  ;;  %v3575_v39 = vmov 0  ;;  %v109_v40 = vadd.s32 1, %v93_v34 }
  0x2d   :  { %1962 = vmatprep.subr.mxu0 %v2373_v3  ;;  %1999 = vmatprep.subr.mxu1 %v2373_v3  ;;  %v3576_v39 = vsel %vm2558_vm14, 4294967295, %v3575_v39  ;;  %vm2564_vm15 = vcmp.eq.s32.totalorder %v2439_v8, %v94_v30  ;;  %v3577_v41 = vmov 0  ;;  %v91_v42 = vadd.s32 40, %v2429_v5 }
  0x2e   :  { %1963 = vmatpush3.msk.msra.mxu0 %vm2520_vm10, %v2375_v16  ;;  %2000 = vmatpush3.msk.msra.mxu1 %vm2526_vm11, %v2375_v16  ;;  %v3578_v41 = vsel %vm2564_vm15, 4294967295, %v3577_v41  ;;  %vm2577_vm0 = vcmp.eq.s32.totalorder %v2427_v4, %v110_v36  ;;  %v3579_v43 = vmov 0  ;;  %v108_v44 = vadd.s32 1, %v92_v38 }
  0x2f   :  { %1964 = vmatprep.subr.mxu0 %v2373_v3  ;;  %2001 = vmatprep.subr.mxu1 %v2373_v3  ;;  %v3580_v43 = vsel %vm2577_vm0, 4294967295, %v3579_v43  ;;  %vm2583_vm11 = vcmp.eq.s32.totalorder %v2439_v8, %v93_v34  ;;  %v3581_v45 = vmov 0  ;;  %v90_v46 = vadd.s32 32, %v2429_v5 }
  0x30   :  { %1965 = vmatpush3.msk.msra.mxu0 %vm2539_vm12, %v2375_v16  ;;  %2002 = vmatpush3.msk.msra.mxu1 %vm2545_vm13, %v2375_v16  ;;  %v3582_v45 = vsel %vm2583_vm11, 4294967295, %v3581_v45  ;;  %vm2596_vm13 = vcmp.eq.s32.totalorder %v2427_v4, %v109_v40  ;;  %v3583_v47 = vmov 0  ;;  %v107_v48 = vadd.s32 1, %v91_v42 }
  0x31   :  { %1966 = vmatprep.subr.mxu0 %v2373_v3  ;;  %2003 = vmatprep.subr.mxu1 %v2373_v3  ;;  %v3584_v47 = vsel %vm2596_vm13, 4294967295, %v3583_v47  ;;  %vm2602_vm9 = vcmp.eq.s32.totalorder %v2439_v8, %v92_v38  ;;  %v3585_v49 = vmov 0  ;;  %v89_v50 = vadd.s32 24, %v2429_v5 }
  0x32   :  { %1967 = vmatpush3.msk.msra.mxu0 %vm2558_vm14, %v2375_v16  ;;  %2004 = vmatpush3.msk.msra.mxu1 %vm2564_vm15, %v2375_v16  ;;  %v3586_v49 = vsel %vm2602_vm9, 4294967295, %v3585_v49  ;;  %vm2615_vm15 = vcmp.eq.s32.totalorder %v2427_v4, %v108_v44  ;;  %v3587_v51 = vmov 0  ;;  %v106_v52 = vadd.s32 1, %v90_v46 }
  0x33   :  { %1968 = vmatprep.subr.mxu0 %v2373_v3  ;;  %2005 = vmatprep.subr.mxu1 %v2373_v3  ;;  %v3588_v51 = vsel %vm2615_vm15, 4294967295, %v3587_v51  ;;  %vm2621_vm7 = vcmp.eq.s32.totalorder %v2439_v8, %v91_v42  ;;  %v3589_v53 = vmov 0  ;;  %v88_v54 = vadd.s32 16, %v2429_v5 }
  0x34   :  { %1969 = vmatpush3.msk.msra.mxu0 %vm2577_vm0, %v2375_v16  ;;  %2006 = vmatpush3.msk.msra.mxu1 %vm2583_vm11, %v2375_v16  ;;  %v3590_v53 = vsel %vm2621_vm7, 4294967295, %v3589_v53  ;;  %vm2634_vm11 = vcmp.eq.s32.totalorder %v2427_v4, %v107_v48  ;;  %v3591_v55 = vmov 0  ;;  %v105_v56 = vadd.s32 1, %v89_v50 }
  0x35   :  { %1970 = vmatprep.subr.mxu0 %v2373_v3  ;;  %2007 = vmatprep.subr.mxu1 %v2373_v3  ;;  %v3592_v55 = vsel %vm2634_vm11, 4294967295, %v3591_v55  ;;  %vm2640_vm5 = vcmp.eq.s32.totalorder %v2439_v8, %v90_v46  ;;  %v3593_v57 = vmov 0  ;;  %v87_v58 = vadd.s32 8, %v2429_v5 }
  0x36   :  { %1971 = vmatpush3.msk.msra.mxu0 %vm2596_vm13, %v2375_v16  ;;  %2008 = vmatpush3.msk.msra.mxu1 %vm2602_vm9, %v2375_v16  ;;  %v3594_v57 = vsel %vm2640_vm5, 4294967295, %v3593_v57  ;;  %vm2653_vm9 = vcmp.eq.s32.totalorder %v2427_v4, %v106_v52  ;;  %v3595_v59 = vmov 0  ;;  %v104_v60 = vadd.s32 1, %v88_v54 }
  0x37   :  { %1972 = vmatprep.subr.mxu0 %v2373_v3  ;;  %2009 = vmatprep.subr.mxu1 %v2373_v3  ;;  %v3596_v59 = vsel %vm2653_vm9, 4294967295, %v3595_v59  ;;  %vm2659_vm2 = vcmp.eq.s32.totalorder %v2439_v8, %v89_v50  ;;  %v3597_v61 = vmov 0  ;;  %v3599_v62 = vmov 0 }
  0x38   :  { %1973 = vmatpush3.msk.msra.mxu0 %vm2615_vm15, %v2375_v16  ;;  %2010 = vmatpush3.msk.msra.mxu1 %vm2621_vm7, %v2375_v16  ;;  %v3598_v61 = vsel %vm2659_vm2, 4294967295, %v3597_v61  ;;  %vm2671_vm7 = vcmp.eq.s32.totalorder %v2427_v4, %v105_v56  ;;  %v103_v63 = vadd.s32 1, %v87_v58  ;;  %vm2677_vm1 = vcmp.eq.s32.totalorder %v2439_v8, %v88_v54 }
  0x39   :  { %1974 = vmatprep.subr.mxu0 %v2373_v3  ;;  %2011 = vmatprep.subr.mxu1 %v2373_v3  ;;  %v3600_v62 = vsel %vm2671_vm7, 4294967295, %v3599_v62  ;;  %v3601_v1 = vmov 0  ;;  %v3603_v2 = vmov 0  ;;  %v102_v6 = vadd.s32 1, %v2429_v5 }
  0x3a   :  { %1975 = vmatpush3.msk.msra.mxu0 %vm2634_vm11, %v2375_v16  ;;  %2012 = vmatpush3.msk.msra.mxu1 %vm2640_vm5, %v2375_v16  ;;  %v3602_v1 = vsel %vm2677_vm1, 4294967295, %v3601_v1  ;;  %vm2689_vm5 = vcmp.eq.s32.totalorder %v2427_v4, %v104_v60  ;;  %vm2696_vm11 = vcmp.eq.s32.totalorder %v2439_v8, %v87_v58  ;;  %v3605_v7 = vmov 0 }
  0x3b   :  { %1976 = vmatprep.subr.mxu0 %v2373_v3  ;;  %2013 = vmatprep.subr.mxu1 %v2373_v3  ;;  %v3604_v2 = vsel %vm2689_vm5, 4294967295, %v3603_v2  ;;  %v3606_v7 = vsel %vm2696_vm11, 4294967295, %v3605_v7  ;;  %v3607_v9 = vmov 0  ;;  %v3609_v10 = vmov 0 }
  0x3c   :  { %1977 = vmatpush3.msk.msra.mxu0 %vm2653_vm9, %v2375_v16  ;;  %2014 = vmatpush3.msk.msra.mxu1 %vm2659_vm2, %v2375_v16  ;;  %vm2708_vm2 = vcmp.eq.s32.totalorder %v2427_v4, %v103_v63  ;;  %vm2715_vm9 = vcmp.eq.s32.totalorder %v2439_v8, %v2429_v5  ;;  %v3611_v11 = vmov 0  ;;  %v1638_v8 = vld [vmem:[%s3473_s0] ss:$0 sm:$0xff]  ;;  %s3438_s0 = sld [smem:[#allocation6 + $0x9]] }
  0x3d   :  { %1978 = vmatprep.subr.mxu0 %v2373_v3  ;;  %2015 = vmatprep.subr.mxu1 %v2373_v3  ;;  %v3608_v9 = vsel %vm2708_vm2, 4294967295, %v3607_v9  ;;  %v3610_v10 = vsel %vm2715_vm9, 4294967295, %v3609_v10  ;;  %v2813_v18 = vmul.u32.u64.low 2863311531, %v2427_v4  ;;  %v2814_v21 = vmul.u32.u64.high 2863311531, %v2427_v4, %v2813_v18 }
  0x3e   :  { %1979 = vmatpush3.msk.msra.mxu0 %vm2671_vm7, %v2375_v16  ;;  %2016 = vmatpush3.msk.msra.mxu1 %vm2677_vm1, %v2375_v16  ;;  %vm2727_vm1 = vcmp.eq.s32.totalorder %v2427_v4, %v102_v6 }
  0x3f   :  { %1980 = vmatprep.subr.mxu0 %v2373_v3  ;;  %2017 = vmatprep.subr.mxu1 %v2373_v3  ;;  %v3612_v11 = vsel %vm2727_vm1, 4294967295, %v3611_v11  ;;  %v56_v24 = vshrl.u32 %v2814_v21, 3 }
  0x40   :  { %1981 = vmatpush3.msk.msra.mxu0 %vm2689_vm5, %v2375_v16  ;;  %2018 = vmatpush3.msk.msra.mxu1 %vm2696_vm11, %v2375_v16 }
  0x41   :  { %1982 = vmatprep.subr.mxu0 %v2373_v3  ;;  %2019 = vmatprep.subr.mxu1 %v2373_v3  ;;  %v57_v26 = vmul.u32 12, %v56_v24  ;;  %v419_v24 = vrot.slane %v2423_v0, 6  ;;  %v2846_v0 = vld [vmem:[%s3474_s1 + $0x10] sm:$0xff] }
  0x42   :  { %1983 = vmatpush3.msk.msra.mxu0 %vm2708_vm2, %v2375_v16  ;;  %2020 = vmatpush3.msk.msra.mxu1 %vm2715_vm9, %v2375_v16  ;;  %vm3613_vm9 = vmmov 0  }
  0x43   :  { %1984 = vmatprep.subr.mxu0 %v2373_v3  ;;  %2029 = vmatprep.subr.mxu1 %v2373_v3  ;;  %v58_v28 = vsub.s32 %v2427_v4, %v57_v26  ;;  %v2376_v26 = vmov 1  }
  0x44   :  { %1985 = vmatpush3.msk.msra.mxu0 %vm2727_vm1, %v2375_v16 }
  0x45   :  { %v64_v30 = vadd.s32 12, %v58_v28 }
  0x9a   :  { %v231_v12 = vpop.permute.xlu0 %230 }
  0x9b   :  { %v239_v13 = vmul.f32 %v1638_v8, %v231_v12 }
  0x9d   :  { %1987 = vmatmul.mubr.f32.vlgmr.msra.gmra.mxu0 %v239_v13  ;;  %v313_v15 = vrot.slane %v239_v13, 4  ;;  %v241_v34 = vrot.slane %v239_v13, 2 }
  0x9f   :  { %2022 = vmatmul.mubr.f32.vlgmr.msra.gmra.mxu1 %v313_v15  ;;  %v2834_v15 = vld [vmem:[%s3475_s2] sm:$0xff] }
  0xa0   :  { %2030 = vmatpush3.msk.msra.mxu1 %vm2459_vm3, %v2375_v16  ;;  %2061 = vmatprep.mubr.msk.f32.mxu1 %vm3613_vm9, %v2373_v3 }
  0xa1   :  { %2031 = vmatprep.subr.mxu1 %v2373_v3 }
  0xa2   :  { %2032 = vmatpush3.msk.msra.mxu1 %vm2464_vm4, %v2375_v16 }
  0xa3   :  { %2033 = vmatprep.subr.mxu1 %v2373_v3 }
  0xa4   :  { %2034 = vmatpush3.msk.msra.mxu1 %vm2482_vm6, %v2375_v16 }
  0xa5   :  { %2035 = vmatprep.subr.mxu1 %v2373_v3 }
  0xa6   :  { %2036 = vmatpush3.msk.msra.mxu1 %vm2501_vm8, %v2375_v16 }
  0xa7   :  { %2037 = vmatprep.subr.mxu1 %v2373_v3 }
  0xa8   :  { %2038 = vmatpush3.msk.msra.mxu1 %vm2520_vm10, %v2375_v16 }
  0xa9   :  { %2039 = vmatprep.subr.mxu1 %v2373_v3 }
  0xaa   :  { %2040 = vmatpush3.msk.msra.mxu1 %vm2539_vm12, %v2375_v16 }
  0xab   :  { %2041 = vmatprep.subr.mxu1 %v2373_v3 }
  0xac   :  { %2042 = vmatpush3.msk.msra.mxu1 %vm2558_vm14, %v2375_v16  ;;  %vm3614_vm14 = vnez %v3592_v55 }
  0xad   :  { %2043 = vmatprep.subr.mxu1 %v2373_v3 }
  0xae   :  { %2044 = vmatpush3.msk.msra.mxu1 %vm2577_vm0, %v2375_v16  ;;  %vm3615_vm0 = vnez %v3596_v59 }
  0xaf   :  { %2045 = vmatprep.subr.mxu1 %v2373_v3 }
  0xb0   :  { %2046 = vmatpush3.msk.msra.mxu1 %vm2596_vm13, %v2375_v16 }
  0xb1   :  { %2047 = vmatprep.subr.mxu1 %v2373_v3 }
  0xb2   :  { %2048 = vmatpush3.msk.msra.mxu1 %vm2615_vm15, %v2375_v16 }
  0xb3   :  { %2049 = vmatprep.subr.mxu1 %v2373_v3 }
  0xb4   :  { %2050 = vmatpush3.msk.msra.mxu1 %vm3614_vm14, %v2375_v16  ;;  %vm3532_vm14 = vcmp.lt.s32.totalorder %v2427_v4, 96 }
  0xb5   :  { %2051 = vmatprep.subr.mxu1 %v2373_v3 }
  0xb6   :  { %2052 = vmatpush3.msk.msra.mxu1 %vm3615_vm0, %v2375_v16 }
  0xb7   :  { %2053 = vmatprep.subr.mxu1 %v2373_v3 }
  0xb8   :  { %2054 = vmatpush3.msk.msra.mxu1 %vm2671_vm7, %v2375_v16  ;;  %vm62_vm7 = vcmp.lt.s32.totalorder %v58_v28, 0 }
  0xb9   :  { %2055 = vmatprep.subr.mxu1 %v2373_v3 }
  0xba   :  { %2056 = vmatpush3.msk.msra.mxu1 %vm2689_vm5, %v2375_v16  ;;  %vm61_vm5 = vcmp.ne.s32.totalorder %v58_v28, 0 }
  0xbb   :  { %2057 = vmatprep.subr.mxu1 %v2373_v3 }
  0xbc   :  { %2058 = vmatpush3.msk.msra.mxu1 %vm2708_vm2, %v2375_v16  ;;  %vm63_vm2 = vmand %vm62_vm7, %vm61_vm5  ;;  %vm3617_vm5 = vnez %v3552_v17  ;;  %vm3618_vm7 = vnez %v3558_v22 }
  0xbd   :  { %2059 = vmatprep.subr.mxu1 %v2373_v3  ;;  %v2818_v32 = vsel %vm63_vm2, %v64_v30, %v58_v28  ;;  %vm3531_vm2 = vcmask 1041408   ;;  %v216_v28 = vld [vmem:[%s3474_s1 + $0x8] sm:$0xff] }
  0xbe   :  { %2060 = vmatpush3.msk.msra.mxu1 %vm2727_vm1, %v2375_v16  ;;  %vm67_vm0 = vcmp.ge.s32.totalorder %v2818_v32, 1  ;;  %vm68_vm1 = vcmp.le.s32.totalorder %v2818_v32, 10  ;;  %v420_v30 = vrot.slane %v216_v28, 6 }
  0xbf   :  { %2099 = vmatprep.subr.mxu1 %v2373_v3  ;;  %vm69_vm15 = vmand %vm67_vm0, %vm68_vm1  ;;  %vm424_vm0 = vcmask 15360   ;;  %vm3616_vm1 = vnez %v3550_v14 }
  0xc0   :  { %vm70_vm13 = vmand %vm69_vm15, %vm3532_vm14  ;;  %vm3620_vm15 = vnez %v3566_v29  ;;  %vm3623_vm14 = vnez %v3578_v41 }
  0xc1   :  { %v2826_v44 = vsel %vm70_vm13, 1.0, %v2373_v3  ;;  %vm3619_vm13 = vnez %v3562_v25 }
 0x15d   :  { %v309_v36 = vpop.f32.mrf.mxu0 }
 0x15e   :  { %v310_v38 = vadd.f32 %v309_v36, %v241_v34  ;;  %v421_v34 = vsel %vm3531_vm2, %v419_v24, %v420_v30 }
 0x15f   :  { %v1988_v40 = vpop.f32.mrf.mxu0  ;;  %v381_v42 = vpop.f32.mrf.mxu1  ;;  %2026 = vmatprep.mubr.msk.f32.mxu0 %vm424_vm0, %v421_v34  ;;  %v2378_v34 = vmov 3  }
 0x160   :  { %v385_v46 = vadd.f32 %v381_v42, %v310_v38 }
 0x161   :  { %v2023_v48 = vpop.f32.mrf.mxu1 }
 0x162   :  { %v386_v50 = vmul.f32 %v2826_v44, %v385_v46 }
 0x164   :  { %v388_v52 = vsel %vm3531_vm2, %v386_v50, 0.0  ;;  %v392_v54 = vmul.f32 %v386_v50, %v386_v50  ;;  %v422_v50 = vrot.slane %v2846_v0, 6 }
 0x165   :  { %389 = vadd.xlane.f32.xlu0 %v388_v52 }
 0x166   :  { %v393_v56 = vsel %vm3531_vm2, %v392_v54, 0.0 }
 0x167   :  { %394 = vadd.xlane.f32.xlu1 %v393_v56  ;;  %v423_v56 = vsel %vm3531_vm2, %v420_v30, %v422_v50  ;;  %v2377_v30 = vmov 2  }
 0x168   :  { %2288 = vset.pattern.permute.xlu0 %v2377_v30  ;;  %v3005_v30 = vld [vmem:[%s3474_s1 + $0x28] sm:$0xff] }
 0x1ee   :  { %v390_v58 = vpop.xlane.xlu0 %389 }
 0x1ef   :  { %v391_v60 = vmul.f32 0.0125, %v390_v58 }
 0x1f0   :  { %v395_v63 = vpop.xlane.xlu1 %394 }
 0x1f1   :  { %v397_v6 = vmul.f32 %v391_v60, %v391_v60  ;;  %v396_v8 = vmul.f32 0.0125, %v395_v63  ;;  %v402_v38 = vsub.f32 %v385_v46, %v391_v60 }
 0x1f3   :  { %v398_v12 = vsub.f32 %v396_v8, %v397_v6 }
 0x1f5   :  { %v399_v13 = vadd.f32 1e-05, %v398_v12 }
 0x1f7   :  { %2296 = vrsqrt.f32 %v399_v13 }
 0x204   :  { %v2297_v18 = vpop.eup %2296 }
 0x205   :  { %v401_v21 = vmul.f32 %v2297_v18, %v2834_v15 }
 0x207   :  { %405 = vperm.xlu1 %2286, %v401_v21  }
 0x20b   :  { %2287 = vset.pattern.permute.xlu1 %v2376_v26 }
 0x20c   :  { %411 = vperm.xlu1 %2287, %v2834_v15  }
 0x210   :  { %2289 = vset.pattern.permute.xlu1 %v2378_v34 }
 0x282   :  { %v406_v36 = vpop.permute.xlu1 %405 }
 0x283   :  { %v408_v40 = vmul.f32 %v406_v36, %v402_v38 }
 0x287   :  { %v412_v42 = vpop.permute.xlu1 %411 }
 0x288   :  { %v414_v48 = vadd.f32 %v412_v42, %v408_v40 }
 0x28a   :  { %v415_v52 = vmax.f32 %v414_v48, 0.0 }
 0x28c   :  { %v416_v54 = vmul.f32 %v2826_v44, %v415_v52 }
 0x28e   :  { %2024 = vmatprep.subr.msk.mxu0 %vm3531_vm2, %v416_v54 }
 0x28f   :  { %2025 = vmatpush3.msk.msra.mxu0 %vm3531_vm2, %v416_v54  ;;  %vm3622_vm2 = vnez %v3574_v37 }
 0x290   :  { %2027 = vmatmul.mubr.msk.f32.vlgmr.msra.gmra.mxu0 %vm424_vm0, %v423_v56  ;;  %2064 = vmatprep.subr.mxu0 %v2373_v3  ;;  %vm3621_vm0 = vnez %v3570_v33 }
 0x291   :  { %2065 = vmatpush3.msk.msra.mxu0 %vm3616_vm1, %v2375_v16  ;;  %2096 = vmatprep.mubr.msk.f32.mxu0 %vm3613_vm9, %v2373_v3 }
 0x292   :  { %2066 = vmatprep.subr.mxu0 %v2373_v3 }
 0x293   :  { %2067 = vmatpush3.msk.msra.mxu0 %vm3617_vm5, %v2375_v16 }
 0x294   :  { %2068 = vmatprep.subr.mxu0 %v2373_v3 }
 0x295   :  { %2069 = vmatpush3.msk.msra.mxu0 %vm3618_vm7, %v2375_v16 }
 0x296   :  { %2070 = vmatprep.subr.mxu0 %v2373_v3 }
 0x297   :  { %2071 = vmatpush3.msk.msra.mxu0 %vm3619_vm13, %v2375_v16 }
 0x298   :  { %2072 = vmatprep.subr.mxu0 %v2373_v3 }
 0x299   :  { %2073 = vmatpush3.msk.msra.mxu0 %vm3620_vm15, %v2375_v16  ;;  %vm3624_vm15 = vnez %v3582_v45 }
 0x29a   :  { %2074 = vmatprep.subr.mxu0 %v2373_v3 }
 0x29b   :  { %2075 = vmatpush3.msk.msra.mxu0 %vm3621_vm0, %v2375_v16  ;;  %vm3625_vm0 = vnez %v3586_v49 }
 0x29c   :  { %2076 = vmatprep.subr.mxu0 %v2373_v3 }
 0x29d   :  { %2077 = vmatpush3.msk.msra.mxu0 %vm3622_vm2, %v2375_v16  ;;  %vm3626_vm2 = vnez %v3590_v53 }
 0x29e   :  { %2078 = vmatprep.subr.mxu0 %v2373_v3 }
 0x29f   :  { %2079 = vmatpush3.msk.msra.mxu0 %vm3623_vm14, %v2375_v16  ;;  %vm3627_vm14 = vnez %v3594_v57 }
 0x2a0   :  { %2080 = vmatprep.subr.mxu0 %v2373_v3 }
 0x2a1   :  { %2081 = vmatpush3.msk.msra.mxu0 %vm3624_vm15, %v2375_v16  ;;  %vm3628_vm15 = vnez %v3598_v61 }
 0x2a2   :  { %2082 = vmatprep.subr.mxu0 %v2373_v3 }
 0x2a3   :  { %2083 = vmatpush3.msk.msra.mxu0 %vm3625_vm0, %v2375_v16  ;;  %vm3629_vm0 = vnez %v3602_v1 }
 0x2a4   :  { %2084 = vmatprep.subr.mxu0 %v2373_v3 }
 0x2a5   :  { %2085 = vmatpush3.msk.msra.mxu0 %vm3626_vm2, %v2375_v16 }
 0x2a6   :  { %2086 = vmatprep.subr.mxu0 %v2373_v3 }
 0x2a7   :  { %2087 = vmatpush3.msk.msra.mxu0 %vm3627_vm14, %v2375_v16  ;;  %vm3630_vm14 = vnez %v3610_v10 }
 0x2a8   :  { %2088 = vmatprep.subr.mxu0 %v2373_v3 }
 0x2a9   :  { %2089 = vmatpush3.msk.msra.mxu0 %vm3628_vm15, %v2375_v16 }
 0x2aa   :  { %2090 = vmatprep.subr.mxu0 %v2373_v3 }
 0x2ab   :  { %2091 = vmatpush3.msk.msra.mxu0 %vm3629_vm0, %v2375_v16 }
 0x2ac   :  { %2092 = vmatprep.subr.mxu0 %v2373_v3 }
 0x2ad   :  { %2093 = vmatpush3.msk.msra.mxu0 %vm2696_vm11, %v2375_v16 }
 0x2ae   :  { %2094 = vmatprep.subr.mxu0 %v2373_v3 }
 0x2af   :  { %2095 = vmatpush3.msk.msra.mxu0 %vm3630_vm14, %v2375_v16 }
 0x2b0   :  { %2110 = vmatprep.subr.mxu0 %v2373_v3 }
 0x350   :  { %v2028_v46 = vpop.f32.mrf.mxu0 }
 0x351   :  { %2097 = vmatmul.mubr.f32.vlgmr.msra.gmra.mxu0 %v2028_v46 }
 0x352   :  { %v498_v58 = vpop.f32.mrf.mxu0  ;;  %2111 = vmatpush3.msk.msra.mxu0 %vm2459_vm3, %v2375_v16  ;;  %2142 = vmatprep.mubr.msk.f32.mxu0 %vm3613_vm9, %v2373_v3 }
 0x353   :  { %2062 = vmatmul.mubr.f32.vlgmr.msra.gmra.mxu1 %v498_v58  ;;  %2112 = vmatprep.subr.mxu0 %v2373_v3  ;;  %v508_v63 = vrot.slane %v498_v58, 4 }
 0x354   :  { %2101 = vmatprep.mubr.msk.f32.mxu1 %vm3613_vm9, %v2373_v3  ;;  %2113 = vmatpush3.msk.msra.mxu0 %vm2464_vm4, %v2375_v16 }
 0x355   :  { %2114 = vmatprep.subr.mxu0 %v2373_v3 }
 0x356   :  { %2115 = vmatpush3.msk.msra.mxu0 %vm2482_vm6, %v2375_v16  ;;  %vm3631_vm6 = vnez %v3576_v39 }
 0x357   :  { %2116 = vmatprep.subr.mxu0 %v2373_v3 }
 0x358   :  { %2117 = vmatpush3.msk.msra.mxu0 %vm2501_vm8, %v2375_v16  ;;  %vm3632_vm8 = vnez %v3580_v43 }
 0x359   :  { %2118 = vmatprep.subr.mxu0 %v2373_v3 }
 0x35a   :  { %2119 = vmatpush3.msk.msra.mxu0 %vm2520_vm10, %v2375_v16  ;;  %vm3633_vm10 = vnez %v3584_v47 }
 0x35b   :  { %2120 = vmatprep.subr.mxu0 %v2373_v3 }
 0x35c   :  { %2121 = vmatpush3.msk.msra.mxu0 %vm2539_vm12, %v2375_v16  ;;  %vm3634_vm12 = vnez %v3588_v51 }
 0x35d   :  { %2122 = vmatprep.subr.mxu0 %v2373_v3 }
 0x35e   :  { %2123 = vmatpush3.msk.msra.mxu0 %vm3631_vm6, %v2375_v16  ;;  %vm3635_vm6 = vnez %v3592_v55 }
 0x35f   :  { %2124 = vmatprep.subr.mxu0 %v2373_v3 }
 0x360   :  { %2125 = vmatpush3.msk.msra.mxu0 %vm3632_vm8, %v2375_v16  ;;  %vm3636_vm8 = vnez %v3596_v59 }
 0x361   :  { %2126 = vmatprep.subr.mxu0 %v2373_v3 }
 0x362   :  { %2127 = vmatpush3.msk.msra.mxu0 %vm3633_vm10, %v2375_v16  ;;  %vm3637_vm10 = vnez %v3600_v62 }
 0x363   :  { %2128 = vmatprep.subr.mxu0 %v2373_v3 }
 0x364   :  { %2129 = vmatpush3.msk.msra.mxu0 %vm3634_vm12, %v2375_v16  ;;  %vm3638_vm12 = vnez %v3604_v2 }
 0x365   :  { %2130 = vmatprep.subr.mxu0 %v2373_v3 }
 0x366   :  { %2131 = vmatpush3.msk.msra.mxu0 %vm3635_vm6, %v2375_v16  ;;  %vm3639_vm6 = vnez %v3608_v9 }
 0x367   :  { %2132 = vmatprep.subr.mxu0 %v2373_v3 }
 0x368   :  { %2133 = vmatpush3.msk.msra.mxu0 %vm3636_vm8, %v2375_v16  ;;  %vm3640_vm8 = vnez %v3612_v11 }
 0x369   :  { %2134 = vmatprep.subr.mxu0 %v2373_v3 }
 0x36a   :  { %2135 = vmatpush3.msk.msra.mxu0 %vm3637_vm10, %v2375_v16 }
 0x36b   :  { %2136 = vmatprep.subr.mxu0 %v2373_v3 }
 0x36c   :  { %2137 = vmatpush3.msk.msra.mxu0 %vm3638_vm12, %v2375_v16  ;;  %vm3541_vm12 = vcmask 1043456  }
 0x36d   :  { %2138 = vmatprep.subr.mxu0 %v2373_v3 }
 0x36e   :  { %2139 = vmatpush3.msk.msra.mxu0 %vm3639_vm6, %v2375_v16  ;;  %vm3641_vm6 = vcmask 1043456  }
 0x36f   :  { %2140 = vmatprep.subr.mxu0 %v2373_v3 }
 0x370   :  { %2141 = vmatpush3.msk.msra.mxu0 %vm3640_vm8, %v2375_v16  ;;  %vm692_vm8 = vcmask 31744  }
 0x371   :  { %2180 = vmatprep.subr.mxu0 %v2373_v3 }
 0x411   :  { %v646_v60 = vpop.f32.mrf.mxu0 }
 0x413   :  { %v576_v6 = vpop.f32.mrf.mxu1  ;;  %v2098_v8 = vpop.f32.mrf.mxu0 }
 0x414   :  { %v577_v12 = vadd.f32 %v576_v6, %v508_v63  ;;  %v218_v63 = vld [vmem:[%s3474_s1 + $0x18] sm:$0xff] }
 0x415   :  { %v2063_v13 = vpop.f32.mrf.mxu1 }
 0x416   :  { %v650_v18 = vadd.f32 %v646_v60, %v577_v12  ;;  %v685_v12 = vrot.slane %v2846_v0, 2  ;;  %v686_v13 = vrot.slane %v218_v63, 2  ;;  %v690_v0 = vrot.slane %v3005_v30, 2 }
 0x418   :  { %v651_v21 = vmul.f32 %v2826_v44, %v650_v18 }
 0x41a   :  { %v653_v24 = vsel %vm3541_vm12, %v651_v21, 0.0  ;;  %v657_v26 = vmul.f32 %v651_v21, %v651_v21  ;;  %v219_v21 = vld [vmem:[%s3474_s1 + $0x20] sm:$0xff] }
 0x41b   :  { %654 = vadd.xlane.f32.xlu1 %v653_v24 }
 0x41c   :  { %v658_v28 = vsel %vm3541_vm12, %v657_v26, 0.0  ;;  %vm3542_vm12 = vcmask 1045504  }
 0x41d   :  { %659 = vadd.xlane.f32.xlu0 %v658_v28  ;;  %v688_v28 = vrot.slane %v219_v21, 2  ;;  %v222_v21 = vld [vmem:[%s3474_s1 + $0x38] sm:$0xff] }
 0x41f   :  { %v691_v34 = vsel %vm3542_vm12, %v688_v28, %v690_v0 }
 0x42c   :  { %675 = vperm.xlu1 %2289, %v2834_v15  }
 0x4a4   :  { %v655_v36 = vpop.xlane.xlu1 %654 }
 0x4a5   :  { %v656_v38 = vmul.f32 0.0125, %v655_v36 }
 0x4a6   :  { %v660_v40 = vpop.xlane.xlu0 %659 }
 0x4a7   :  { %v662_v42 = vmul.f32 %v656_v38, %v656_v38  ;;  %v661_v48 = vmul.f32 0.0125, %v660_v40  ;;  %v667_v46 = vsub.f32 %v650_v18, %v656_v38  ;;  %v687_v18 = vsel %vm3542_vm12, %v685_v12, %v686_v13 }
 0x4a8   :  { %v676_v60 = vpop.permute.xlu1 %675 }
 0x4a9   :  { %v663_v50 = vsub.f32 %v661_v48, %v662_v42 }
 0x4ab   :  { %v664_v52 = vadd.f32 1e-05, %v663_v50 }
 0x4ad   :  { %2298 = vrsqrt.f32 %v664_v52 }
 0x4ba   :  { %v2299_v54 = vpop.eup %2298 }
 0x4bb   :  { %v666_v56 = vmul.f32 %v2299_v54, %v2834_v15 }
 0x4bd   :  { %670 = vperm.xlu0 %2288, %v666_v56  }
 0x538   :  { %v671_v58 = vpop.permute.xlu0 %670 }
 0x539   :  { %v673_v6 = vmul.f32 %v671_v58, %v667_v46 }
 0x53b   :  { %v678_v8 = vadd.f32 %v676_v60, %v673_v6  ;;  %v221_v6 = vld [vmem:[%s3474_s1 + $0x30] sm:$0xff] }
 0x53d   :  { %v679_v24 = vmax.f32 %v678_v8, 0.0 }
 0x53f   :  { %v680_v26 = vmul.f32 %v2826_v44, %v679_v24  ;;  %v689_v44 = vsel %vm3542_vm12, %v686_v13, %v688_v28  ;;  %vm3643_vm12 = vnez %v3570_v33  ;;  %v954_v13 = vrot.slane %v221_v6, 2 }
 0x540   :  { %v956_v28 = vrot.slane %v222_v21, 2  ;;  %v2382_v21 = vmov 7  }
 0x541   :  { %2100 = vmatpush3.msk.msra.mxu1 %vm3641_vm6, %v680_v26  ;;  %vm3642_vm6 = vnez %v3566_v29 }
 0x542   :  { %2102 = vmatmul.mubr.msk.f32.vlgmr.msra.gmra.mxu1 %vm692_vm8, %v687_v18  ;;  %2145 = vmatprep.subr.mxu1 %v2373_v3 }
 0x543   :  { %2104 = vmatprep.mubr.msk.f32.mxu1 %vm3613_vm9, %v2373_v3  ;;  %2146 = vmatpush3.msk.msra.mxu1 %vm3616_vm1, %v2375_v16 }
 0x544   :  { %2147 = vmatprep.subr.mxu1 %v2373_v3 }
 0x545   :  { %2148 = vmatpush3.msk.msra.mxu1 %vm3617_vm5, %v2375_v16 }
 0x546   :  { %2105 = vmatmul.mubr.msk.f32.gmra.mxu1 %vm692_vm8, %v689_v44  ;;  %2149 = vmatprep.subr.mxu1 %v2373_v3  ;;  %v223_v44 = vld [vmem:[%s3474_s1 + $0x40] sm:$0xff] }
 0x547   :  { %2107 = vmatprep.mubr.msk.f32.mxu1 %vm3613_vm9, %v2373_v3  ;;  %2150 = vmatpush3.msk.msra.mxu1 %vm3618_vm7, %v2375_v16 }
 0x548   :  { %2151 = vmatprep.subr.mxu1 %v2373_v3 }
 0x549   :  { %2152 = vmatpush3.msk.msra.mxu1 %vm3619_vm13, %v2375_v16  ;;  %vm3646_vm13 = vnez %v3582_v45 }
 0x54a   :  { %2108 = vmatmul.mubr.msk.f32.gmra.mxu1 %vm692_vm8, %v691_v34  ;;  %2153 = vmatprep.subr.mxu1 %v2373_v3  ;;  %vm3644_vm8 = vnez %v3574_v37  ;;  %v958_v34 = vrot.slane %v223_v44, 2 }
 0x54b   :  { %2154 = vmatpush3.msk.msra.mxu1 %vm3642_vm6, %v2375_v16  ;;  %2177 = vmatprep.mubr.msk.f32.mxu1 %vm3613_vm9, %v2373_v3  ;;  %vm3645_vm6 = vnez %v3578_v41 }
 0x54c   :  { %2155 = vmatprep.subr.mxu1 %v2373_v3 }
 0x54d   :  { %2156 = vmatpush3.msk.msra.mxu1 %vm3643_vm12, %v2375_v16  ;;  %vm3647_vm12 = vnez %v3586_v49 }
 0x54e   :  { %2157 = vmatprep.subr.mxu1 %v2373_v3 }
 0x54f   :  { %2158 = vmatpush3.msk.msra.mxu1 %vm3644_vm8, %v2375_v16 }
 0x550   :  { %2159 = vmatprep.subr.mxu1 %v2373_v3 }
 0x551   :  { %2160 = vmatpush3.msk.msra.mxu1 %vm3645_vm6, %v2375_v16  ;;  %vm3648_vm6 = vnez %v3594_v57 }
 0x552   :  { %2161 = vmatprep.subr.mxu1 %v2373_v3 }
 0x553   :  { %2162 = vmatpush3.msk.msra.mxu1 %vm3646_vm13, %v2375_v16 }
 0x554   :  { %2163 = vmatprep.subr.mxu1 %v2373_v3 }
 0x555   :  { %2164 = vmatpush3.msk.msra.mxu1 %vm3647_vm12, %v2375_v16 }
 0x556   :  { %2165 = vmatprep.subr.mxu1 %v2373_v3 }
 0x557   :  { %2166 = vmatpush3.msk.msra.mxu1 %vm3626_vm2, %v2375_v16 }
 0x558   :  { %2167 = vmatprep.subr.mxu1 %v2373_v3 }
 0x559   :  { %2168 = vmatpush3.msk.msra.mxu1 %vm3648_vm6, %v2375_v16 }
 0x55a   :  { %2169 = vmatprep.subr.mxu1 %v2373_v3 }
 0x55b   :  { %2170 = vmatpush3.msk.msra.mxu1 %vm3628_vm15, %v2375_v16 }
 0x55c   :  { %2171 = vmatprep.subr.mxu1 %v2373_v3 }
 0x55d   :  { %2172 = vmatpush3.msk.msra.mxu1 %vm3629_vm0, %v2375_v16  ;;  %vm3662_vm0 = vcmp.lt.s32.totalorder %v2427_v4, 96 }
 0x55e   :  { %2173 = vmatprep.subr.mxu1 %v2373_v3 }
 0x55f   :  { %2174 = vmatpush3.msk.msra.mxu1 %vm2696_vm11, %v2375_v16  ;;  %vm3650_vm11 = vnez %v3564_v27 }
 0x560   :  { %2175 = vmatprep.subr.mxu1 %v2373_v3 }
 0x561   :  { %2176 = vmatpush3.msk.msra.mxu1 %vm3630_vm14, %v2375_v16  ;;  %vm3649_vm14 = vnez %v3560_v23 }
 0x562   :  { %2197 = vmatprep.subr.msk.mxu1 %vm2459_vm3, %v2375_v16 }
 0x602   :  { %v768_v36 = vpop.f32.mrf.mxu1 }
 0x603   :  { %2143 = vmatmul.mubr.f32.vlgmr.msra.gmra.mxu0 %v768_v36 }
 0x604   :  { %v2103_v38 = vpop.f32.mrf.mxu1  ;;  %2182 = vmatprep.mubr.msk.f32.mxu0 %vm3613_vm9, %v2373_v3 }
 0x606   :  { %v773_v40 = vpop.f32.mrf.mxu1 }
 0x608   :  { %v2106_v42 = vpop.f32.mrf.mxu1 }
 0x60a   :  { %v778_v48 = vpop.f32.mrf.mxu1 }
 0x60b   :  { %2178 = vmatmul.mubr.f32.vlgmr.msra.gmra.mxu1 %v778_v48 }
 0x60c   :  { %v2109_v50 = vpop.f32.mrf.mxu1  ;;  %2198 = vmatpush3.msk.msra.mxu1 %vm2459_vm3, %v2375_v16  ;;  %vm3651_vm3 = vnez %v3568_v31 }
 0x60d   :  { %2199 = vmatprep.subr.msk.mxu1 %vm2464_vm4, %v2375_v16 }
 0x60e   :  { %2200 = vmatpush3.msk.msra.mxu1 %vm2464_vm4, %v2375_v16  ;;  %vm3652_vm4 = vnez %v3572_v35 }
 0x60f   :  { %2201 = vmatprep.subr.msk.mxu1 %vm3649_vm14, %v2375_v16 }
 0x610   :  { %2202 = vmatpush3.msk.msra.mxu1 %vm3649_vm14, %v2375_v16  ;;  %vm3653_vm14 = vnez %v3576_v39 }
 0x611   :  { %2203 = vmatprep.subr.msk.mxu1 %vm3650_vm11, %v2375_v16 }
 0x612   :  { %2204 = vmatpush3.msk.msra.mxu1 %vm3650_vm11, %v2375_v16  ;;  %vm3654_vm11 = vnez %v3580_v43 }
 0x613   :  { %2205 = vmatprep.subr.msk.mxu1 %vm3651_vm3, %v2375_v16 }
 0x614   :  { %2206 = vmatpush3.msk.msra.mxu1 %vm3651_vm3, %v2375_v16  ;;  %vm3655_vm3 = vnez %v3584_v47 }
 0x615   :  { %2207 = vmatprep.subr.msk.mxu1 %vm3652_vm4, %v2375_v16 }
 0x616   :  { %2208 = vmatpush3.msk.msra.mxu1 %vm3652_vm4, %v2375_v16  ;;  %vm3656_vm4 = vnez %v3588_v51  ;;  %v2379_v51 = vmov 4  }
 0x617   :  { %2209 = vmatprep.subr.msk.mxu1 %vm3653_vm14, %v2375_v16  ;;  %2290 = vset.pattern.permute.xlu0 %v2379_v51 }
 0x618   :  { %2210 = vmatpush3.msk.msra.mxu1 %vm3653_vm14, %v2375_v16  ;;  %vm3657_vm14 = vnez %v3592_v55  ;;  %v2380_v55 = vmov 5  }
 0x619   :  { %2211 = vmatprep.subr.msk.mxu1 %vm3654_vm11, %v2375_v16  ;;  %2291 = vset.pattern.permute.xlu1 %v2380_v55 }
 0x61a   :  { %2212 = vmatpush3.msk.msra.mxu1 %vm3654_vm11, %v2375_v16  ;;  %vm3658_vm11 = vnez %v3596_v59 }
 0x61b   :  { %2213 = vmatprep.subr.msk.mxu1 %vm3655_vm3, %v2375_v16 }
 0x61c   :  { %2214 = vmatpush3.msk.msra.mxu1 %vm3655_vm3, %v2375_v16  ;;  %vm3659_vm3 = vnez %v3604_v2 }
 0x61d   :  { %2215 = vmatprep.subr.msk.mxu1 %vm3656_vm4, %v2375_v16 }
 0x61e   :  { %2216 = vmatpush3.msk.msra.mxu1 %vm3656_vm4, %v2375_v16  ;;  %vm3660_vm4 = vnez %v3608_v9 }
 0x61f   :  { %2217 = vmatprep.subr.msk.mxu1 %vm3657_vm14, %v2375_v16 }
 0x620   :  { %2218 = vmatpush3.msk.msra.mxu1 %vm3657_vm14, %v2375_v16  ;;  %vm3661_vm14 = vnez %v3612_v11 }
 0x621   :  { %2219 = vmatprep.subr.msk.mxu1 %vm3658_vm11, %v2375_v16 }
 0x622   :  { %2220 = vmatpush3.msk.msra.mxu1 %vm3658_vm11, %v2375_v16  ;;  %vm74_vm11 = vcmp.le.s32.totalorder %v2818_v32, 9 }
 0x623   :  { %2221 = vmatprep.subr.msk.mxu1 %vm3637_vm10, %v2375_v16 }
 0x624   :  { %2222 = vmatpush3.msk.msra.mxu1 %vm3637_vm10, %v2375_v16  ;;  %vm73_vm10 = vcmp.ge.s32.totalorder %v2818_v32, 2 }
 0x625   :  { %2223 = vmatprep.subr.msk.mxu1 %vm3659_vm3, %v2375_v16 }
 0x626   :  { %2224 = vmatpush3.msk.msra.mxu1 %vm3659_vm3, %v2375_v16  ;;  %vm75_vm3 = vmand %vm73_vm10, %vm74_vm11  ;;  %vm3670_vm11 = vnez %v3578_v41 }
 0x627   :  { %2225 = vmatprep.subr.msk.mxu1 %vm3660_vm4, %v2375_v16  ;;  %vm76_vm15 = vmand %vm75_vm3, %vm3662_vm0  ;;  %vm962_vm0 = vcmask 64512   ;;  %vm80_vm3 = vcmp.le.s32.totalorder %v2818_v32, 8 }
 0x628   :  { %2226 = vmatpush3.msk.msra.mxu1 %vm3660_vm4, %v2375_v16  ;;  %v1604_v31 = vsel %vm76_vm15, 1.0, %v2373_v3  ;;  %vm3663_vm15 = vcmask 1045504  }
 0x629   :  { %2227 = vmatprep.subr.msk.mxu1 %vm3661_vm14, %v2375_v16  ;;  %v955_v18 = vsel %vm3663_vm15, %v690_v0, %v954_v13  ;;  %vm3664_vm4 = vmmov %vm3663_vm15  ;;  %v224_v0 = vld [vmem:[%s3474_s1 + $0x48] sm:$0x3f] }
 0x62a   :  { %2228 = vmatpush3.msk.msra.mxu1 %vm3661_vm14, %v2375_v16  ;;  %v957_v30 = vsel %vm3664_vm4, %v954_v13, %v956_v28  ;;  %v960_v36 = vrot.slane %v224_v0, 2  ;;  %vm3666_vm14 = vnez %v3562_v25  ;;  %v1279_v0 = vmul.u32 48, %v2429_v5 }
 0x6c3   :  { %v848_v19 = vpop.f32.mrf.mxu0 }
 0x6c4   :  { %v849_v23 = vadd.f32 %v848_v19, %v773_v40 }
 0x6c5   :  { %v2144_v20 = vpop.f32.mrf.mxu0 }
 0x6cb   :  { %v918_v27 = vpop.f32.mrf.mxu1 }
 0x6cc   :  { %v922_v35 = vadd.f32 %v918_v27, %v849_v23 }
 0x6cd   :  { %v2179_v39 = vpop.f32.mrf.mxu1 }
 0x6ce   :  { %v923_v43 = vmul.f32 %v1604_v31, %v922_v35 }
 0x6d0   :  { %924 = vadd.xlane.f32.xlu1 %v923_v43  ;;  %v927_v47 = vmul.f32 %v923_v43, %v923_v43  ;;  %v2381_v43 = vmov 6  }
 0x6d2   :  { %928 = vadd.xlane.f32.xlu0 %v927_v47 }
 0x6e1   :  { %944 = vperm.xlu1 %2291, %v2834_v15  }
 0x6e5   :  { %2292 = vset.pattern.permute.xlu1 %v2381_v43 }
 0x759   :  { %v925_v59 = vpop.xlane.xlu1 %924 }
 0x75a   :  { %v926_v62 = vmul.f32 0.015625, %v925_v59 }
 0x75b   :  { %v929_v2 = vpop.xlane.xlu0 %928 }
 0x75c   :  { %v931_v9 = vmul.f32 %v926_v62, %v926_v62  ;;  %v930_v11 = vmul.f32 0.015625, %v929_v2  ;;  %v936_v58 = vsub.f32 %v922_v35, %v926_v62 }
 0x75d   :  { %v945_v63 = vpop.permute.xlu1 %944 }
 0x75e   :  { %v932_v52 = vsub.f32 %v930_v11, %v931_v9 }
 0x760   :  { %v933_v54 = vadd.f32 1e-05, %v932_v52 }
 0x762   :  { %2300 = vrsqrt.f32 %v933_v54 }
 0x76f   :  { %v2301_v56 = vpop.eup %2300 }
 0x770   :  { %v935_v46 = vmul.f32 %v2301_v56, %v2834_v15 }
 0x772   :  { %939 = vperm.xlu0 %2290, %v935_v46  }
 0x776   :  { %2293 = vset.pattern.permute.xlu0 %v2381_v43  ;;  %v1406_v43 = vld [vmem:[#allocation2 + $0x28] sm:$0xff] }
 0x7ed   :  { %v940_v60 = vpop.permute.xlu0 %939 }
 0x7ee   :  { %v942_v8 = vmul.f32 %v940_v60, %v936_v58 }
 0x7f0   :  { %v947_v12 = vadd.f32 %v945_v63, %v942_v8  ;;  %v226_v63 = vld [vmem:[%s3475_s2 + $0x8] sm:$0xf]  ;;  %s1781_s2 = sld [smem:[#allocation6 + $0x1]] }
 0x7f2   :  { %v948_v24 = vmax.f32 %v947_v12, 0.0 }
 0x7f4   :  { %v949_v26 = vmul.f32 %v1604_v31, %v948_v24 }
 0x7f6   :  { %2181 = vmatpush3.msra.mxu0 %v949_v26 }
 0x7f7   :  { %2183 = vmatmul.mubr.msk.f32.vlgmr.msra.gmra.mxu0 %vm962_vm0, %v955_v18  ;;  %2232 = vmatprep.subr.msk.mxu0 %vm3616_vm1, %v2375_v16 }
 0x7f8   :  { %2185 = vmatprep.mubr.msk.f32.mxu0 %vm3613_vm9, %v2373_v3  ;;  %2233 = vmatpush3.msk.msra.mxu0 %vm3616_vm1, %v2375_v16  ;;  %vm3665_vm1 = vmmov %vm3664_vm4 }
 0x7f9   :  { %2234 = vmatprep.subr.msk.mxu0 %vm3617_vm5, %v2375_v16  ;;  %v959_v14 = vsel %vm3665_vm1, %v956_v28, %v958_v34  ;;  %vm3668_vm10 = vmmov %vm3665_vm1 }
 0x7fa   :  { %2235 = vmatpush3.msk.msra.mxu0 %vm3617_vm5, %v2375_v16  ;;  %vm3667_vm5 = vnez %v3566_v29  ;;  %v961_v17 = vsel %vm3668_vm10, %v958_v34, %v960_v36 }
 0x7fb   :  { %2186 = vmatmul.mubr.msk.f32.gmra.mxu0 %vm962_vm0, %v957_v30  ;;  %2236 = vmatprep.subr.msk.mxu0 %vm3618_vm7, %v2375_v16 }
 0x7fc   :  { %2188 = vmatprep.mubr.msk.f32.mxu0 %vm3613_vm9, %v2373_v3  ;;  %2237 = vmatpush3.msk.msra.mxu0 %vm3618_vm7, %v2375_v16  ;;  %vm3669_vm7 = vnez %v3570_v33 }
 0x7fd   :  { %2238 = vmatprep.subr.msk.mxu0 %vm3666_vm14, %v2375_v16 }
 0x7fe   :  { %2239 = vmatpush3.msk.msra.mxu0 %vm3666_vm14, %v2375_v16 }
 0x7ff   :  { %2189 = vmatmul.mubr.msk.f32.gmra.mxu0 %vm962_vm0, %v959_v14  ;;  %2240 = vmatprep.subr.msk.mxu0 %vm3667_vm5, %v2375_v16 }
 0x800   :  { %2191 = vmatprep.mubr.msk.f32.mxu0 %vm3613_vm9, %v2373_v3  ;;  %2241 = vmatpush3.msk.msra.mxu0 %vm3667_vm5, %v2375_v16 }
 0x801   :  { %2242 = vmatprep.subr.msk.mxu0 %vm3669_vm7, %v2375_v16 }
 0x802   :  { %2243 = vmatpush3.msk.msra.mxu0 %vm3669_vm7, %v2375_v16 }
 0x803   :  { %2192 = vmatmul.mubr.msk.f32.gmra.mxu0 %vm962_vm0, %v961_v17  ;;  %2244 = vmatprep.subr.msk.mxu0 %vm3644_vm8, %v2375_v16  ;;  %v1311_v17 = vld [vmem:[#allocation2 + $0x68] sm:$0xf] }
 0x804   :  { %2194 = vmatprep.mubr.msk.f32.mxu0 %vm3613_vm9, %v2373_v3  ;;  %2245 = vmatpush3.msk.msra.mxu0 %vm3644_vm8, %v2375_v16  ;;  %vm3671_vm9 = vnez %v3598_v61  ;;  %vm79_vm8 = vcmp.ge.s32.totalorder %v2818_v32, 3 }
 0x805   :  { %2246 = vmatprep.subr.msk.mxu0 %vm3670_vm11, %v2375_v16  ;;  %vm81_vm15 = vmand %vm79_vm8, %vm80_vm3 }
 0x806   :  { %2247 = vmatpush3.msk.msra.mxu0 %vm3670_vm11, %v2375_v16  ;;  %vm3355_vm11 = vcmp.ge.s32.totalorder %v2427_v4, %v1279_v0 }
 0x807   :  { %2195 = vmatmul.mubr.msk.f32.gmra.mxu0 %vm962_vm0, %v960_v36  ;;  %2248 = vmatprep.subr.msk.mxu0 %vm3646_vm13, %v2375_v16  ;;  %vm3676_vm0 = vcmp.lt.s32.totalorder %v2427_v4, 96 }
 0x808   :  { %2249 = vmatpush3.msk.msra.mxu0 %vm3646_vm13, %v2375_v16  ;;  %vm3674_vm13 = vnez %v3610_v10  ;;  %vm82_vm4 = vmand %vm81_vm15, %vm3676_vm0  ;;  %vm3689_vm15 = vcmask 1041408  }
 0x809   :  { %2250 = vmatprep.subr.msk.mxu0 %vm3647_vm12, %v2375_v16  ;;  %v3324_v42 = vsel %vm82_vm4, 1.0, %v2373_v3  ;;  %vm3690_vm0 = vmmov %vm3689_vm15 }
 0x80a   :  { %2251 = vmatpush3.msk.msra.mxu0 %vm3647_vm12, %v2375_v16  ;;  %vm3672_vm12 = vnez %v3602_v1  ;;  %vm3691_vm4 = vmmov %vm3690_vm0 }
 0x80b   :  { %2252 = vmatprep.subr.msk.mxu0 %vm3626_vm2, %v2375_v16 }
 0x80c   :  { %2253 = vmatpush3.msk.msra.mxu0 %vm3626_vm2, %v2375_v16  ;;  %vm3673_vm2 = vnez %v3606_v7 }
 0x80d   :  { %2254 = vmatprep.subr.msk.mxu0 %vm3648_vm6, %v2375_v16 }
 0x80e   :  { %2255 = vmatpush3.msk.msra.mxu0 %vm3648_vm6, %v2375_v16  ;;  %vm3675_vm6 = vcmask 1043456  }
 0x80f   :  { %2256 = vmatprep.subr.msk.mxu0 %vm3671_vm9, %v2375_v16  ;;  %vm3677_vm1 = vmmov %vm3675_vm6 }
 0x810   :  { %2257 = vmatpush3.msk.msra.mxu0 %vm3671_vm9, %v2375_v16  ;;  %vm3678_vm14 = vmmov %vm3677_vm1 }
 0x811   :  { %2258 = vmatprep.subr.msk.mxu0 %vm3672_vm12, %v2375_v16  ;;  %vm3679_vm5 = vmmov %vm3677_vm1 }
 0x812   :  { %2259 = vmatpush3.msk.msra.mxu0 %vm3672_vm12, %v2375_v16  ;;  %vm3680_vm10 = vmmov %vm3677_vm1 }
 0x813   :  { %2260 = vmatprep.subr.msk.mxu0 %vm3673_vm2, %v2375_v16  ;;  %vm3681_vm7 = vmmov %vm3677_vm1 }
 0x814   :  { %2261 = vmatpush3.msk.msra.mxu0 %vm3673_vm2, %v2375_v16  ;;  %vm3684_vm12 = vmmov %vm3677_vm1 }
 0x815   :  { %2262 = vmatprep.subr.msk.mxu0 %vm3674_vm13, %v2375_v16  ;;  %vm3685_vm2 = vmmov %vm3677_vm1 }
 0x816   :  { %2263 = vmatpush3.msk.msra.mxu0 %vm3674_vm13, %v2375_v16  ;;  %vm3686_vm13 = vmmov %vm3677_vm1 }
 0x817   :  { %vm3688_vm8 = vmmov %vm3677_vm1 }
 0x8b7   :  { %v1039_v22 = vpop.f32.mrf.mxu0 }
 0x8b8   :  { %2229 = vmatprep.mubr.f32.mxu1 %v1039_v22 }
 0x8b9   :  { %v2184_v25 = vpop.f32.mrf.mxu0 }
 0x8ba   :  { %v1287_v25 = vld [vmem:[#allocation2 + $0x60] sm:$0xf] }
 0x8bb   :  { %v1044_v29 = vpop.f32.mrf.mxu0 }
 0x8bc   :  { %2230 = vmatmul.mubr.f32.vlgmr.msra.gmra.mxu1 %v1044_v29  ;;  %v1065_v41 = vrot.slane %v1044_v29, 4  ;;  %v1503_v29 = vld [vmem:[#allocation2 + $0xa8] sm:$0xf] }
 0x8bd   :  { %v2187_v33 = vpop.f32.mrf.mxu0 }
 0x8be   :  { %v1335_v33 = vld [vmem:[#allocation2 + $0x70] sm:$0xf] }
 0x8bf   :  { %v1049_v37 = vpop.f32.mrf.mxu0 }
 0x8c0   :  { %v1066_v45 = vrot.slane %v1049_v37, 4 }
 0x8c1   :  { %v2190_v49 = vpop.f32.mrf.mxu0 }
 0x8c2   :  { %v1067_v53 = vsel %vm3675_vm6, %v1065_v41, %v1066_v45  ;;  %v1551_v41 = vld [vmem:[#allocation2 + $0xb8] sm:$0xf]  ;;  %v1383_v49 = vld [vmem:[#allocation2 + $0x80] sm:$0xf]  ;;  %vm3687_vm6 = vmmov %vm3677_vm1 }
 0x8c3   :  { %v1054_v57 = vpop.f32.mrf.mxu0 }
 0x8c4   :  { %2264 = vmatprep.mubr.f32.mxu0 %v1054_v57 }
 0x8c5   :  { %v2193_v61 = vpop.f32.mrf.mxu0 }
 0x8c6   :  { %v1310_v61 = vld [vmem:[#allocation2 + $0x8] sm:$0xff] }
 0x8c7   :  { %v1059_v1 = vpop.f32.mrf.mxu0 }
 0x8c8   :  { %2265 = vmatmul.mubr.f32.vlgmr.msra.gmra.mxu0 %v1059_v1  ;;  %v1286_v1 = vld [vmem:[#allocation2] sm:$0xff] }
 0x8c9   :  { %v2196_v7 = vpop.f32.mrf.mxu0 }
 0x97c   :  { %v2231_v16 = vpop.f32.mrf.mxu1 }
 0x97d   :  { %v1142_v38 = vadd.f32 %v2231_v16, %v1066_v45  ;;  %v1359_v45 = vld [vmem:[#allocation2 + $0x78] sm:$0xf] }
 0x97e   :  { %v1136_v10 = vpop.f32.mrf.mxu1 }
 0x97f   :  { %v1137_v48 = vadd.f32 %v1136_v10, %v1067_v53  ;;  %v3339_v53 = vadd.s32 48, %v1279_v0  ;;  %v1502_v10 = vld [vmem:[#allocation2 + $0x48] sm:$0xff] }
 0x981   :  { %vm1282_vm9 = vcmp.lt.s32.totalorder %v2427_v4, %v3339_v53 }
 0x982   :  { %vm1283_vm3 = vmand %vm3355_vm11, %vm1282_vm9 }
 0x983   :  { %vm3697_vm11 = vmmov %vm3690_vm0 }
 0x984   :  { %vm3698_vm9 = vmmov %vm3690_vm0 }
 0x988   :  { %v2266_v40 = vpop.f32.mrf.mxu0 }
 0x989   :  { %v1221_v50 = vadd.f32 %v2266_v40, %v1142_v38  ;;  %v1334_v38 = vld [vmem:[#allocation2 + $0x10] sm:$0xff] }
 0x98a   :  { %v1211_v19 = vpop.f32.mrf.mxu0 }
 0x98b   :  { %v1220_v20 = vadd.f32 %v1211_v19, %v1137_v48  ;;  %v1223_v23 = vmul.f32 %v3324_v42, %v1221_v50  ;;  %v1550_v48 = vld [vmem:[#allocation2 + $0x58] sm:$0xff] }
 0x98d   :  { %v1226_v27 = vsel %vm3677_vm1, %v1223_v23, 0.0  ;;  %v1222_v32 = vmul.f32 %v3324_v42, %v1220_v20  ;;  %v1232_v31 = vmul.f32 %v1223_v23, %v1223_v23  ;;  %vm3692_vm1 = vmmov %vm3690_vm0 }
 0x98e   :  { %1227 = vadd.xlane.f32.xlu1 %v1226_v27 }
 0x98f   :  { %1224 = vadd.xlane.f32.xlu0 %v1222_v32  ;;  %v1235_v35 = vsel %vm3678_vm14, %v1232_v31, 0.0  ;;  %v1231_v39 = vmul.f32 %v1222_v32, %v1222_v32  ;;  %vm3693_vm14 = vmmov %vm3685_vm2 }
 0x992   :  { %1236 = vadd.xlane.f32.xlu1 %v1235_v35  ;;  %v1358_v35 = vld [vmem:[#allocation2 + $0x18] sm:$0xff] }
 0x996   :  { %1233 = vadd.xlane.f32.xlu1 %v1231_v39  ;;  %v1382_v39 = vld [vmem:[#allocation2 + $0x20] sm:$0xff] }
 0xa17   :  { %v1228_v47 = vpop.xlane.xlu1 %1227 }
 0xa18   :  { %v1230_v51 = vmul.f32 0.020833334, %v1228_v47  ;;  %v1225_v55 = vpop.xlane.xlu0 %1224 }
 0xa19   :  { %v1229_v2 = vmul.f32 0.020833334, %v1225_v55 }
 0xa1a   :  { %v1241_v62 = vmul.f32 %v1230_v51, %v1230_v51  ;;  %v1251_v26 = vsub.f32 %v1221_v50, %v1230_v51 }
 0xa1b   :  { %v1237_v59 = vpop.xlane.xlu1 %1236  ;;  %v1240_v54 = vmul.f32 %v1229_v2, %v1229_v2  ;;  %v1250_v30 = vsub.f32 %v1220_v20, %v1229_v2 }
 0xa1c   :  { %v1239_v9 = vmul.f32 0.020833334, %v1237_v59 }
 0xa1e   :  { %v1243_v11 = vsub.f32 %v1239_v9, %v1241_v62 }
 0xa1f   :  { %v1234_v52 = vpop.xlane.xlu1 %1233 }
 0xa20   :  { %v1245_v56 = vadd.f32 1e-05, %v1243_v11  ;;  %v1238_v46 = vmul.f32 0.020833334, %v1234_v52  ;;  %v1407_v52 = vld [vmem:[#allocation2 + $0x88] sm:$0xf] }
 0xa22   :  { %2302 = vrsqrt.f32 %v1245_v56  ;;  %v1242_v58 = vsub.f32 %v1238_v46, %v1240_v54 }
 0xa24   :  { %v1244_v60 = vadd.f32 1e-05, %v1242_v58 }
 0xa26   :  { %2304 = vrsqrt.f32 %v1244_v60 }
 0xa2f   :  { %v2303_v6 = vpop.eup %2302 }
 0xa30   :  { %v1249_v8 = vmul.f32 %v2303_v6, %v226_v63 }
 0xa32   :  { %1259 = vperm.xlu1 %2292, %v1249_v8  }
 0xa33   :  { %v2305_v12 = vpop.eup %2304 }
 0xa34   :  { %v1248_v13 = vmul.f32 %v2305_v12, %v2834_v15 }
 0xa36   :  { %2294 = vset.pattern.permute.xlu1 %v2382_v21  ;;  %1254 = vperm.xlu0 %2293, %v1248_v13  }
 0xa37   :  { %1270 = vperm.xlu1 %2294, %v226_v63  }
 0xa3a   :  { %2295 = vset.pattern.permute.xlu0 %v2382_v21 }
 0xa3b   :  { %1265 = vperm.xlu1 %2294, %v2834_v15  }
 0xaad   :  { %v1260_v24 = vpop.permute.xlu1 %1259 }
 0xaae   :  { %v1263_v18 = vmul.f32 %v1260_v24, %v1251_v26 }
 0xab1   :  { %v1255_v28 = vpop.permute.xlu0 %1254 }
 0xab2   :  { %v1271_v44 = vpop.permute.xlu1 %1270  ;;  %v1262_v14 = vmul.f32 %v1255_v28, %v1250_v30 }
 0xab3   :  { %v1274_v34 = vadd.f32 %v1271_v44, %v1263_v18 }
 0xab5   :  { %v1276_v36 = vmax.f32 %v1274_v34, 0.0 }
 0xab6   :  { %v1266_v22 = vpop.permute.xlu1 %1265 }
 0xab7   :  { %v3337_v37 = vmul.f32 %v3324_v42, %v1276_v36  ;;  %v1273_v15 = vadd.f32 %v1266_v22, %v1262_v14 }
 0xab9   :  { %v1275_v57 = vmax.f32 %v1273_v15, 0.0  ;;  %v1313_v5 = vmul.f32 %v1311_v17, %v3337_v37  ;;  %v1289_v7 = vmul.f32 %v1287_v25, %v3337_v37  ;;  %v1505_v16 = vmul.f32 %v1503_v29, %v3337_v37 }
 0xaba   :  { %v1337_v40 = vmul.f32 %v1335_v33, %v3337_v37  ;;  %v1553_v50 = vmul.f32 %v1551_v41, %v3337_v37  ;;  %v1361_v19 = vmul.f32 %v1359_v45, %v3337_v37  ;;  %v1385_v20 = vmul.f32 %v1383_v49, %v3337_v37 }
 0xabb   :  { %v3349_v23 = vmul.f32 %v3324_v42, %v1275_v57  ;;  %v1314_v27 = vsel %vm3679_vm5, %v1313_v5, 0.0  ;;  %v1290_v32 = vsel %vm3680_vm10, %v1289_v7, 0.0  ;;  %v1506_v31 = vsel %vm3681_vm7, %v1505_v16, 0.0  ;;  %vm3694_vm5 = vmmov %vm3685_vm2 }
 0xabc   :  { %v1338_v42 = vsel %vm3684_vm12, %v1337_v40, 0.0  ;;  %v1554_v51 = vsel %vm3685_vm2, %v1553_v50, 0.0  ;;  %v1362_v55 = vsel %vm3686_vm13, %v1361_v19, 0.0  ;;  %v1386_v59 = vsel %vm3687_vm6, %v1385_v20, 0.0  ;;  %vm3695_vm10 = vmmov %vm3685_vm2 }
 0xabd   :  { %v1312_v62 = vmul.f32 %v1310_v61, %v3349_v23  ;;  %v1288_v2 = vmul.f32 %v1286_v1, %v3349_v23  ;;  %v1504_v9 = vmul.f32 %v1502_v10, %v3349_v23  ;;  %v1336_v11 = vmul.f32 %v1334_v38, %v3349_v23  ;;  %vm3696_vm7 = vmmov %vm3685_vm2 }
 0xabe   :  { %v1552_v54 = vmul.f32 %v1550_v48, %v3349_v23  ;;  %v1360_v56 = vmul.f32 %v1358_v35, %v3349_v23  ;;  %v1384_v46 = vmul.f32 %v1382_v39, %v3349_v23  ;;  %v1408_v58 = vmul.f32 %v1406_v43, %v3349_v23  ;;  %vm3699_vm12 = vmmov %vm3690_vm0 }
 0xabf   :  { %v1315_v60 = vadd.f32 %v1314_v27, %v1312_v62  ;;  %v1291_v63 = vadd.f32 %v1290_v32, %v1288_v2  ;;  %v1507_v6 = vadd.f32 %v1506_v31, %v1504_v9  ;;  %v1339_v8 = vadd.f32 %v1338_v42, %v1336_v11  ;;  %vm3700_vm2 = vmmov %vm3690_vm0 }
 0xac0   :  { %v1555_v12 = vadd.f32 %v1554_v51, %v1552_v54  ;;  %v1363_v13 = vadd.f32 %v1362_v55, %v1360_v56  ;;  %v1387_v21 = vadd.f32 %v1386_v59, %v1384_v46  ;;  %v1409_v24 = vmul.f32 %v1407_v52, %v3337_v37  ;;  %v1431_v46 = vld [vmem:[#allocation2 + $0x90] sm:$0xf]  ;;  %vm3701_vm13 = vmmov %vm3690_vm0 }
 0xac1   :  { %v1316_v26 = vrot.slane %v1315_v60, 4  ;;  %v1292_v18 = vrot.slane %v1291_v63, 4  ;;  %v1508_v28 = vrot.slane %v1507_v6, 4  ;;  %v1340_v44 = vrot.slane %v1339_v8, 4  ;;  %vm3702_vm6 = vmmov %vm3690_vm0 }
 0xac2   :  { %v1556_v30 = vrot.slane %v1555_v12, 4  ;;  %v1364_v34 = vrot.slane %v1363_v13, 4  ;;  %v1388_v0 = vrot.slane %v1387_v21, 4  ;;  %v1410_v14 = vsel %vm3688_vm8, %v1409_v24, 0.0  ;;  %v1479_v24 = vld [vmem:[#allocation2 + $0xa0] sm:$0xf]  ;;  %vm3703_vm8 = vmmov %vm3690_vm0 }
 0xac3   :  { %v1317_v36 = vadd.f32 %v1316_v26, %v1315_v60  ;;  %v1293_v17 = vadd.f32 %v1292_v18, %v1291_v63  ;;  %v1509_v22 = vadd.f32 %v1508_v28, %v1507_v6  ;;  %v1341_v25 = vadd.f32 %v1340_v44, %v1339_v8  ;;  %v1430_v60 = vld [vmem:[#allocation2 + $0x30] sm:$0xff]  ;;  %v1454_v63 = vld [vmem:[#allocation2 + $0x38] sm:$0xff] }
 0xac4   :  { %v1557_v29 = vadd.f32 %v1556_v30, %v1555_v12  ;;  %v1365_v33 = vadd.f32 %v1364_v34, %v1363_v13  ;;  %v1389_v15 = vadd.f32 %v1388_v0, %v1387_v21  ;;  %v1411_v41 = vadd.f32 %v1410_v14, %v1408_v58  ;;  %v1455_v6 = vld [vmem:[#allocation2 + $0x98] sm:$0xf]  ;;  %v1478_v21 = vld [vmem:[#allocation2 + $0x40] sm:$0xff]  ;;  %v1526_v26 = vld [vmem:[#allocation2 + $0x50] sm:$0xff] }
 0xac5   :  { %v1318_v45 = vrot.slane %v1317_v36, 2  ;;  %v1294_v49 = vrot.slane %v1293_v17, 2  ;;  %v1510_v57 = vrot.slane %v1509_v22, 2  ;;  %v1342_v61 = vrot.slane %v1341_v25, 2  ;;  %v1527_v34 = vld [vmem:[#allocation2 + $0xb0] sm:$0xf] }
 0xac6   :  { %v1558_v5 = vrot.slane %v1557_v29, 2  ;;  %v1366_v1 = vrot.slane %v1365_v33, 2  ;;  %v1390_v7 = vrot.slane %v1389_v15, 2  ;;  %v1412_v16 = vrot.slane %v1411_v41, 4 }
 0xac7   :  { %v1319_v10 = vadd.f32 %v1318_v45, %v1317_v36  ;;  %v1295_v38 = vadd.f32 %v1294_v49, %v1293_v17  ;;  %v1511_v40 = vadd.f32 %v1510_v57, %v1509_v22  ;;  %v1343_v48 = vadd.f32 %v1342_v61, %v1341_v25 }
 0xac8   :  { %v1559_v50 = vadd.f32 %v1558_v5, %v1557_v29  ;;  %v1367_v19 = vadd.f32 %v1366_v1, %v1365_v33  ;;  %v1391_v20 = vadd.f32 %v1390_v7, %v1389_v15  ;;  %v1413_v27 = vadd.f32 %v1412_v16, %v1411_v41 }
 0xac9   :  { %v1320_v32 = vrot.slane %v1319_v10, 1  ;;  %v1296_v31 = vrot.slane %v1295_v38, 1  ;;  %v1512_v35 = vrot.slane %v1511_v40, 1  ;;  %v1344_v39 = vrot.slane %v1343_v48, 1 }
 0xaca   :  { %v3381_v43 = vsel %vm1283_vm3, 1.0, %v2373_v3  ;;  %v1560_v42 = vrot.slane %v1559_v50, 1  ;;  %v1368_v53 = vrot.slane %v1367_v19, 1  ;;  %v1414_v51 = vrot.slane %v1413_v27, 2  ;;  %vm3704_vm3 = vmmov %vm3690_vm0 }
 0xacb   :  { %v1321_v47 = vadd.f32 %v1320_v32, %v1319_v10  ;;  %v1297_v55 = vadd.f32 %v1296_v31, %v1295_v38  ;;  %v1513_v59 = vadd.f32 %v1512_v35, %v1511_v40  ;;  %v1345_v62 = vadd.f32 %v1344_v39, %v1343_v48 }
 0xacc   :  { %v1561_v2 = vadd.f32 %v1560_v42, %v1559_v50  ;;  %v1369_v9 = vadd.f32 %v1368_v53, %v1367_v19  ;;  %v1392_v11 = vrot.slane %v1391_v20, 1  ;;  %v1415_v52 = vadd.f32 %v1414_v51, %v1413_v27 }
 0xacd   :  { %v1322_v54 = vmul.f32 %v3381_v43, %v1321_v47  ;;  %v1298_v56 = vmul.f32 %v3381_v43, %v1297_v55  ;;  %v1514_v58 = vmul.f32 %v3381_v43, %v1513_v59  ;;  %v1346_v13 = vmul.f32 %v3381_v43, %v1345_v62 }
 0xace   :  { %v1562_v18 = vmul.f32 %v3381_v43, %v1561_v2  ;;  %v1370_v28 = vmul.f32 %v3381_v43, %v1369_v9  ;;  %v1393_v44 = vadd.f32 %v1392_v11, %v1391_v20  ;;  %v1416_v30 = vrot.slane %v1415_v52, 1 }
 0xacf   :  { %v1323_v8 = vsel %vm3689_vm15, %v1322_v54, 0.0  ;;  %v1299_v12 = vsel %vm3690_vm0, %v1298_v56, 0.0  ;;  %v1432_v0 = vmul.f32 %v1430_v60, %v3349_v23  ;;  %v1433_v14 = vmul.f32 %v1431_v46, %v3337_v37 }
 0xad0   :  { %1324 = vadd.xlane.f32.xlu0 %v1323_v8  ;;  %1300 = vadd.xlane.f32.xlu1 %v1299_v12  ;;  %v1456_v36 = vmul.f32 %v1454_v63, %v3349_v23  ;;  %v1457_v17 = vmul.f32 %v1455_v6, %v3337_v37  ;;  %v1515_v22 = vsel %vm3691_vm4, %v1514_v58, 0.0  ;;  %v1480_v25 = vmul.f32 %v1478_v21, %v3349_v23 }
 0xad1   :  { %v1481_v29 = vmul.f32 %v1479_v24, %v3337_v37  ;;  %v1528_v33 = vmul.f32 %v1526_v26, %v3349_v23  ;;  %v1347_v15 = vsel %vm3692_vm1, %v1346_v13, 0.0  ;;  %v1434_v41 = vsel %vm3693_vm14, %v1433_v14, 0.0 }
 0xad2   :  { %v1458_v45 = vsel %vm3694_vm5, %v1457_v17, 0.0  ;;  %v1529_v49 = vmul.f32 %v1527_v34, %v3337_v37  ;;  %v1435_v57 = vadd.f32 %v1434_v41, %v1432_v0  ;;  %v1394_v16 = vmul.f32 %v3381_v43, %v1393_v44 }
 0xad3   :  { %v1459_v61 = vadd.f32 %v1458_v45, %v1456_v36  ;;  %v1482_v5 = vsel %vm3695_vm10, %v1481_v29, 0.0  ;;  %v1563_v40 = vsel %vm3697_vm11, %v1562_v18, 0.0  ;;  %v1371_v48 = vsel %vm3698_vm9, %v1370_v28, 0.0 }
 0xad4   :  { %1516 = vadd.xlane.f32.xlu0 %v1515_v22  ;;  %1348 = vadd.xlane.f32.xlu1 %v1347_v15  ;;  %v1483_v1 = vadd.f32 %v1482_v5, %v1480_v25  ;;  %v1530_v7 = vsel %vm3696_vm7, %v1529_v49, 0.0  ;;  %v1436_v23 = vrot.slane %v1435_v57, 4  ;;  %v1417_v50 = vadd.f32 %v1416_v30, %v1415_v52 }
 0xad5   :  { %v1460_v10 = vrot.slane %v1459_v61, 4  ;;  %v1531_v38 = vadd.f32 %v1530_v7, %v1528_v33  ;;  %v1395_v42 = vsel %vm3699_vm12, %v1394_v16, 0.0  ;;  %v1327_v34 = vstv %s1781_s2 }
 0xad6   :  { %v1484_v37 = vrot.slane %v1483_v1, 4  ;;  %v1437_v19 = vadd.f32 %v1436_v23, %v1435_v57  ;;  %v1418_v53 = vmul.f32 %v3381_v43, %v1417_v50  ;;  %v1303_v14 = vstv %s1302_s27 }
 0xad7   :  { %v1461_v20 = vadd.f32 %v1460_v10, %v1459_v61  ;;  %v1532_v27 = vrot.slane %v1531_v38, 4  ;;  %vm1329_vm15 = vcmp.eq.s32.totalorder %v2427_v4, 1  ;;  %vm1305_vm0 = vcmp.eq.s32.totalorder %v2427_v4, 0 }
 0xad8   :  { %1564 = vadd.xlane.f32.xlu0 %v1563_v40  ;;  %1372 = vadd.xlane.f32.xlu1 %v1371_v48  ;;  %v1485_v32 = vadd.f32 %v1484_v37, %v1483_v1  ;;  %v1438_v31 = vrot.slane %v1437_v19, 2  ;;  %v1419_v11 = vsel %vm3700_vm2, %v1418_v53, 0.0  ;;  %vm1353_vm4 = vcmp.eq.s32.totalorder %v2427_v4, 2 }
 0xad9   :  { %v1462_v35 = vrot.slane %v1461_v20, 2  ;;  %v1533_v39 = vadd.f32 %v1532_v27, %v1531_v38  ;;  %v1782_v25 = vsel %vm1329_vm15, 1.0, %v2373_v3  ;;  %v1780_v29 = vsel %vm1305_vm0, 1.0, %v2373_v3 }
 0xada   :  { %v1486_v51 = vrot.slane %v1485_v32, 2  ;;  %v1439_v47 = vadd.f32 %v1438_v31, %v1437_v19  ;;  %v1375_v33 = vstv %s1785_s4  ;;  %vm1377_vm1 = vcmp.eq.s32.totalorder %v2427_v4, 3 }
 0xadb   :  { %v1463_v55 = vadd.f32 %v1462_v35, %v1461_v20  ;;  %v1534_v59 = vrot.slane %v1533_v39, 2  ;;  %v1784_v41 = vsel %vm1353_vm4, 1.0, %v2373_v3  ;;  %v1399_v45 = vstv %s3419_s29 }
 0xadc   :  { %1396 = vadd.xlane.f32.xlu1 %v1395_v42  ;;  %v1487_v62 = vadd.f32 %v1486_v51, %v1485_v32  ;;  %v1440_v2 = vrot.slane %v1439_v47, 1  ;;  %vm1401_vm14 = vcmp.eq.s32.totalorder %v2427_v4, 4  ;;  %v1786_v1 = vsel %vm1377_vm1, 1.0, %v2373_v3 }
 0xadd   :  { %v1464_v9 = vrot.slane %v1463_v55, 1  ;;  %v1535_v46 = vadd.f32 %v1534_v59, %v1533_v39  ;;  %v1423_v7 = vstv %s3421_s30  ;;  %vm1425_vm5 = vcmp.eq.s32.totalorder %v2427_v4, 5 }
 0xade   :  { %v1441_v52 = vadd.f32 %v1440_v2, %v1439_v47  ;;  %v1488_v56 = vrot.slane %v1487_v62, 1  ;;  %v1788_v10 = vsel %vm1401_vm14, 1.0, %v2373_v3  ;;  %v1447_v38 = vstv %s3425_s3 }
 0xadf   :  { %v1465_v54 = vadd.f32 %v1464_v9, %v1463_v55  ;;  %v1536_v8 = vrot.slane %v1535_v46, 1  ;;  %vm1449_vm10 = vcmp.eq.s32.totalorder %v2427_v4, 6  ;;  %v1790_v37 = vsel %vm1425_vm5, 1.0, %v2373_v3 }
 0xae0   :  { %1420 = vadd.xlane.f32.xlu1 %v1419_v11  ;;  %v1442_v58 = vmul.f32 %v3381_v43, %v1441_v52  ;;  %v1489_v6 = vadd.f32 %v1488_v56, %v1487_v62  ;;  %vm1473_vm7 = vcmp.eq.s32.totalorder %v2427_v4, 7  ;;  %v1792_v31 = vsel %vm1449_vm10, 1.0, %v2373_v3 }
 0xae1   :  { %v1466_v63 = vmul.f32 %v3381_v43, %v1465_v54  ;;  %v1537_v21 = vadd.f32 %v1536_v8, %v1535_v46  ;;  %v1471_v35 = vstv %s3433_s6  ;;  %v1794_v51 = vsel %vm1473_vm7, 1.0, %v2373_v3 }
 0xae2   :  { %v1443_v60 = vsel %vm3701_vm13, %v1442_v58, 0.0  ;;  %v1490_v13 = vmul.f32 %v3381_v43, %v1489_v6  ;;  %vm1497_vm11 = vcmp.eq.s32.totalorder %v2427_v4, 8  ;;  %v1519_v2 = vstv %s3438_s0 }
 0xae3   :  { %v1467_v12 = vsel %vm3702_vm6, %v1466_v63, 0.0  ;;  %v1538_v26 = vmul.f32 %v3381_v43, %v1537_v21  ;;  %v1351_v43 = vstv %s1783_s28  ;;  %v1495_v9 = vstv %s3443_s7 }
 0xae4   :  { %1444 = vadd.xlane.f32.xlu1 %v1443_v60  ;;  %v1491_v24 = vsel %vm3703_vm8, %v1490_v13, 0.0  ;;  %vm1521_vm9 = vcmp.eq.s32.totalorder %v2427_v4, 9  ;;  %v1796_v54 = vsel %vm1497_vm11, 1.0, %v2373_v3  ;;  %vm1545_vm12 = vcmp.eq.s32.totalorder %v2427_v4, 10 }
 0xae5   :  { %v1539_v18 = vsel %vm3704_vm3, %v1538_v26, 0.0  ;;  %v1798_v63 = vsel %vm1521_vm9, 1.0, %v2373_v3  ;;  %v1567_v6 = vstv %s3447_s8  ;;  %vm1569_vm2 = vcmp.eq.s32.totalorder %v2427_v4, 11 }
 0xae6   :  { %vm1574_vm13 = vcmask 91136  }
 0xae8   :  { %1468 = vadd.xlane.f32.xlu1 %v1467_v12  ;;  %v1543_v12 = vstv %s3452_s9 }
 0xaec   :  { %1492 = vadd.xlane.f32.xlu1 %v1491_v24  ;;  %v1800_v24 = vsel %vm1545_vm12, 1.0, %v2373_v3 }
 0xaf0   :  { %1540 = vadd.xlane.f32.xlu1 %v1539_v18 }
 0xb59   :  { %v1301_v28 = vpop.xlane.xlu1 %1300  ;;  %v1325_v0 = vpop.xlane.xlu0 %1324 }
 0xb5a   :  { %v1328_v36 = vadd.f32 %v1327_v34, %v1325_v0  ;;  %v1304_v17 = vadd.f32 %v1303_v14, %v1301_v28  ;;  %v1802_v34 = vsel %vm1569_vm2, 1.0, %v2373_v3 }
 0xb5c   :  { %v1332_v49 = vmul.f32 %v1782_v25, %v1328_v36  ;;  %v1308_v57 = vmul.f32 %v1780_v29, %v1304_v17 }
 0xb5d   :  { %v1349_v44 = vpop.xlane.xlu1 %1348  ;;  %v1517_v53 = vpop.xlane.xlu0 %1516 }
 0xb5e   :  { %v1352_v15 = vadd.f32 %v1351_v43, %v1349_v44  ;;  %v1333_v40 = vadd.f32 %v1332_v49, %v1308_v57  ;;  %v1520_v46 = vadd.f32 %v1519_v2, %v1517_v53 }
 0xb60   :  { %v1356_v16 = vmul.f32 %v1784_v41, %v1352_v15  ;;  %v1524_v18 = vmul.f32 %v1798_v63, %v1520_v46 }
 0xb61   :  { %v1373_v30 = vpop.xlane.xlu1 %1372  ;;  %v1565_v8 = vpop.xlane.xlu0 %1564 }
 0xb62   :  { %v1376_v61 = vadd.f32 %v1375_v33, %v1373_v30  ;;  %v1357_v20 = vadd.f32 %v1356_v16, %v1333_v40  ;;  %v1568_v28 = vadd.f32 %v1567_v6, %v1565_v8 }
 0xb64   :  { %v1380_v48 = vmul.f32 %v1786_v1, %v1376_v61  ;;  %v1572_v43 = vmul.f32 %v1802_v34, %v1568_v28 }
 0xb65   :  { %v1397_v22 = vpop.xlane.xlu1 %1396 }
 0xb66   :  { %v1400_v23 = vadd.f32 %v1399_v45, %v1397_v22  ;;  %v1381_v39 = vadd.f32 %v1380_v48, %v1357_v20 }
 0xb68   :  { %v1404_v27 = vmul.f32 %v1788_v10, %v1400_v23 }
 0xb69   :  { %v1421_v5 = vpop.xlane.xlu1 %1420 }
 0xb6a   :  { %v1424_v50 = vadd.f32 %v1423_v7, %v1421_v5  ;;  %v1405_v55 = vadd.f32 %v1404_v27, %v1381_v39 }
 0xb6c   :  { %v1428_v42 = vmul.f32 %v1790_v37, %v1424_v50 }
 0xb6d   :  { %v1445_v19 = vpop.xlane.xlu1 %1444 }
 0xb6e   :  { %v1448_v32 = vadd.f32 %v1447_v38, %v1445_v19  ;;  %v1429_v11 = vadd.f32 %v1428_v42, %v1405_v55 }
 0xb70   :  { %v1452_v59 = vmul.f32 %v1792_v31, %v1448_v32 }
 0xb71   :  { %v1469_v47 = vpop.xlane.xlu1 %1468 }
 0xb72   :  { %v1472_v62 = vadd.f32 %v1471_v35, %v1469_v47  ;;  %v1453_v58 = vadd.f32 %v1452_v59, %v1429_v11 }
 0xb74   :  { %v1476_v52 = vmul.f32 %v1794_v51, %v1472_v62 }
 0xb75   :  { %v1493_v56 = vpop.xlane.xlu1 %1492 }
 0xb76   :  { %v1496_v60 = vadd.f32 %v1495_v9, %v1493_v56  ;;  %v1477_v13 = vadd.f32 %v1476_v52, %v1453_v58 }
 0xb78   :  { %v1500_v21 = vmul.f32 %v1796_v54, %v1496_v60 }
 0xb79   :  { %v1541_v26 = vpop.xlane.xlu1 %1540 }
 0xb7a   :  { %v1501_v44 = vadd.f32 %v1500_v21, %v1477_v13  ;;  %v1544_v30 = vadd.f32 %v1543_v12, %v1541_v26 }
 0xb7c   :  { %v1548_v0 = vmul.f32 %v1800_v24, %v1544_v30  ;;  %v1525_v14 = vadd.f32 %v1524_v18, %v1501_v44 }
 0xb7e   :  { %v1549_v36 = vadd.f32 %v1548_v0, %v1525_v14 }
 0xb80   :  { %v1573_v17 = vadd.f32 %v1572_v43, %v1549_v36 }
 0xb82   :  { %v1575_v22 = vsel %vm1574_vm13, %v1573_v17, -inf }
 0xb83   :  { %1576 = vmax.xlane.f32.xlu1 %v1575_v22 }
 0xc0c   :  { %v1577_v4 = vpop.xlane.xlu1 %1576 }
 0xc0d   :  { %v1578_v25 = vsub.f32 %v1573_v17, %v1577_v4 }
 0xc0f   :  { %v1579_v29 = vmul.f32 1.442695, %v1578_v25 }
 0xc11   :  { %2306 = vpow2.f32 %v1579_v29 }
 0xc1e   :  { %v2307_v33 = vpop.eup %2306 }
 0xc1f   :  { %v1581_v15 = vsel %vm1574_vm13, %v2307_v33, 0.0 }
 0xc20   :  { %1582 = vadd.xlane.f32.xlu0 %v1581_v15 }
 0xca9   :  { %v1583_v41 = vpop.xlane.xlu0 %1582 }
 0xcaa   :  { %2308 = vrcp.f32 %v1583_v41 }
 0xcb7   :  { %v2309_v3 = vpop.eup %2308 }
 0xcb8   :  { %v1585_v45 = vmul.f32 %v2309_v3, %v2307_v33 }
 0xcba   :  { %1586 = vst.msk [vmem:[#allocation7] sm:$0x3] %vm1574_vm13, %v1585_v45 }
 0xcbb   :  { %2353 = shalt.err (!%p2350_p0)
}
 0xcbc   :  { %1596 = dma.vmem_to_hbm [thread:$0]  %s1594_s11, 32, %s3478_s5, [#allocation4]  }
 0xcbd   :  { %2366 = dma.done.wait [#allocation4], 32  }
 0xcbe   :  { %2367 = vsyncadd [#allocation4], 4294967264 }
 0xcbf   :  { %1600 = vsyncpa [#allocation3], 1 }
 0xcc0   :  { %1601 = vsyncpa [#allocation4], 1 }
 0xcc1   :  { %1602 = vsyncpa [#allocation5], 1 }

</bundles_post_ra>
